<compile_context>
chip_gen: v6e
topology: v6e:2x2x1
jax: 0.10.0
libtpu: 0.0.40
codegen_flags: <defaults>
</compile_context>

<pallas_src>
import functools

import jax
import jax.numpy as jnp
from jax.experimental import pallas as pl
from jax.experimental.pallas import tpu as pltpu


def _round_up(x, m):
    return ((x + m - 1) // m) * m


def _pad_to(a, shape):
    return jnp.pad(a, [(0, s - d) for d, s in zip(a.shape, shape)])


def _ffn_lm_kernel(x_ref, wcr_ref, bcr_ref, wo_ref, bo_ref, wl_ref, bl_ref,
                   out_ref, h_ref):
    hp = wo_ref.shape[0]                          # padded hidden size (static)

    # Front of the MLP: compute once per M tile (first V step), cache h in VMEM.
    @pl.when(pl.program_id(1) == 0)
    def _():
        x = x_ref[...]                            # (bm, Dp) bf16
        # Fused combination|residual GEMM: one pass of X through the MXU.
        cr = jnp.dot(x, wcr_ref[...], preferred_element_type=jnp.float32) + bcr_ref[...]
        h1 = jnp.maximum(cr[:, :hp], 0.0).astype(jnp.bfloat16)   # relu(combination)
        r = cr[:, hp:]                                           # residual branch (f32)
        h2 = jnp.dot(h1, wo_ref[...], preferred_element_type=jnp.float32) + bo_ref[...]
        h_ref[...] = jnp.maximum(h2 + r, 0.0).astype(jnp.bfloat16)

    # Last layer: one lane-dense vocab tile per grid step.
    logits = jnp.dot(h_ref[...], wl_ref[...],
                     preferred_element_type=jnp.float32) + bl_ref[...]
    out_ref[...] = logits.astype(out_ref.dtype)


def ffn_lm_mlp(x, wc, bc, wo, bo, wr, br, wl, bl, *,
               block_rows=256, block_vocab=1024):
    """x: (N, D) flattened context embeddings; returns (N, V) f32 logits."""
    n, d = x.shape
    h = wc.shape[1]
    v = wl.shape[1]

    # Lane-pad every matmul dimension to 128 (zero padding is inert: padded
    # hidden columns stay zero through relu, padded weight rows contribute 0,
    # padded vocab columns are sliced off at the end).
    dp = _round_up(d, 128)
    hp = _round_up(h, 128)

    # Vocab tile: lane-dense, streams Wl for large vocabularies.
    vn = min(_round_up(v, 128), _round_up(block_vocab, 128))
    vp = _round_up(v, vn)

    # Row tile: big (>=256) for realistic N, but never more than the (8-aligned)
    # problem size for tiny inputs.
    bm = _round_up(min(block_rows, _round_up(n, 8)), 8)
    n_pad = _round_up(n, bm)

    bf16 = jnp.bfloat16
    # Fused [Wc | Wr] weight and [bc | br] bias.
    wcr = jnp.concatenate(
        [_pad_to(wc, (dp, hp)), _pad_to(wr, (dp, hp))], axis=1).astype(bf16)
    bcr = jnp.concatenate(
        [_pad_to(bc.reshape(1, -1), (1, hp)),
         _pad_to(br.reshape(1, -1), (1, hp))], axis=1).astype(jnp.float32)
    wo_p = _pad_to(wo, (hp, hp)).astype(bf16)
    bo_p = _pad_to(bo.reshape(1, -1), (1, hp)).astype(jnp.float32)
    wl_p = _pad_to(wl, (hp, vp)).astype(bf16)
    bl_p = _pad_to(bl.reshape(1, -1), (1, vp)).astype(jnp.float32)

    x_p = _pad_to(x.astype(bf16), (n_pad, dp))

    grid = (n_pad // bm, vp // vn)
    res = lambda i, j: (0, 0)   # resident weights/biases: same block every step

    # Explicit VMEM budget:
    #   resident [Wc|Wr], Wo + biases, double-buffered X / Wl-tile / out-tile,
    #   h scratch, f32 intermediates, plus headroom; capped at v7x's 64 MiB.
    resident_bytes = (wcr.size + wo_p.size) * 2 + (bcr.size + bo_p.size) * 4
    streamed_bytes = 2 * (hp * vn * 2 + vn * 4)          # Wl / bl tiles, dbl-buffered
    io_bytes = 2 * bm * dp * 2 + 2 * bm * vn * 4          # X tile, out tile
    scratch_bytes = bm * hp * 2 + bm * (3 * hp + vn) * 4  # h + intermediates
    vmem_limit = int(min(64 << 20,
                         max(32 << 20, resident_bytes + streamed_bytes +
                             io_bytes + scratch_bytes + (4 << 20))))

    flops = 2 * n_pad * (dp * 2 * hp + hp * hp + hp * vp)
    bytes_accessed = (n_pad * dp * 2 + resident_bytes
                      + hp * vp * 2 + vp * 4 + n_pad * vp * 4)

    out = pl.pallas_call(
        _ffn_lm_kernel,
        out_shape=jax.ShapeDtypeStruct((n_pad, vp), jnp.float32),
        grid=grid,
        in_specs=[
            pl.BlockSpec((bm, dp), lambda i, j: (i, 0)),      # X row tile
            pl.BlockSpec((dp, 2 * hp), res),                  # [Wc | Wr] (resident)
            pl.BlockSpec((1, 2 * hp), res),                   # [bc | br]
            pl.BlockSpec((hp, hp), res),                      # Wo (resident)
            pl.BlockSpec((1, hp), res),                       # bo
            pl.BlockSpec((hp, vn), lambda i, j: (0, j)),      # Wl vocab tile (streamed)
            pl.BlockSpec((1, vn), lambda i, j: (0, j)),       # bl vocab tile
        ],
        out_specs=pl.BlockSpec((bm, vn), lambda i, j: (i, j)),
        scratch_shapes=[pltpu.VMEM((bm, hp), jnp.bfloat16)],  # cached hidden h
        compiler_params=pltpu.CompilerParams(
            dimension_semantics=("parallel", "arbitrary"),
            vmem_limit_bytes=vmem_limit),
        cost_estimate=pl.CostEstimate(flops=flops, transcendentals=0,
                                      bytes_accessed=bytes_accessed),
    )(x_p, wcr, bcr, wo_p, bo_p, wl_p, bl_p)
    return out[:n, :v]


def build_contexts(text, window_size):
    """text: (T, B) int32 token ids.  Returns (T, B, W) context windows,
    reproducing reset_contexts(zeros) + the per-step shift-and-append."""
    T, B = text.shape
    padded = jnp.concatenate(
        [jnp.zeros((window_size, B), text.dtype), text], axis=0)      # (W+T, B)
    idx = jnp.arange(T)[:, None] + jnp.arange(window_size)[None, :]   # (T, W)
    ctx = padded[idx]                                                 # (T, W, B)
    return jnp.transpose(ctx, (0, 2, 1))                              # (T, B, W)


def feedforward_lm_forward(text, params, window_size):
    """text: (T, B) int32.  Returns (T, B, vocab) f32 logits (torch.stack order)."""
    emb, wc, bc, wo, bo, wr, br, wl, bl = params
    T, B = text.shape
    W = window_size
    E = emb.shape[1]

    contexts = build_contexts(text, W)                                # (T, B, W)
    # Gather in bf16 (halves duplicated HBM traffic of the window expansion).
    embs = emb.astype(jnp.bfloat16)[contexts]                         # (T, B, W, E)
    x = embs.reshape(T * B, W * E)                                    # (N, D) bf16
    logits = ffn_lm_mlp(x, wc, bc, wo, bo, wr, br, wl, bl)            # (N, V) f32
    return logits.reshape(T, B, -1)


def _reference_forward(text, params, window_size):
    """Pure-JAX reference mimicking the kernel's bf16-in / f32-accumulate math."""
    emb, wc, bc, wo, bo, wr, br, wl, bl = params
    T, B = text.shape
    bf = lambda a: a.astype(jnp.bfloat16).astype(jnp.float32)
    ctx = build_contexts(text, window_size)
    x = bf(emb)[ctx].reshape(T * B, -1)
    h1 = jnp.maximum(x @ bf(wc) + bc.reshape(1, -1), 0.0)
    r = x @ bf(wr) + br.reshape(1, -1)
    h2 = bf(h1) @ bf(wo) + bo.reshape(1, -1)
    h = jnp.maximum(h2 + r, 0.0)
    return (bf(h) @ bf(wl) + bl.reshape(1, -1)).reshape(T, B, -1)


if __name__ == "__main__":
    # Small synthetic config (shapes implied by the module's __init__/forward).
    # Deliberately not lane-aligned so the wrapper's padding path is exercised.
    vocab_size = 500
    embed_dim = 24
    window_size = 5
    hidden_size = 96
    seq_len = 64
    batch_size = 8
    D = window_size * embed_dim

    key = jax.random.PRNGKey(0)
    ks = jax.random.split(key, 10)

    emb = jax.random.normal(ks[0], (vocab_size, embed_dim), jnp.float32) * 0.1
    # nn.Linear weights, stored transposed to (in_features, out_features).
    wc = jax.random.normal(ks[1], (D, hidden_size), jnp.float32) * 0.05
    bc = jax.random.normal(ks[2], (1, hidden_size), jnp.float32) * 0.05
    wo = jax.random.normal(ks[3], (hidden_size, hidden_size), jnp.float32) * 0.05
    bo = jax.random.normal(ks[4], (1, hidden_size), jnp.float32) * 0.05
    wr = jax.random.normal(ks[5], (D, hidden_size), jnp.float32) * 0.05
    br = jax.random.normal(ks[6], (1, hidden_size), jnp.float32) * 0.05
    wl = jax.random.normal(ks[7], (hidden_size, vocab_size), jnp.float32) * 0.05
    bl = jax.random.normal(ks[8], (1, vocab_size), jnp.float32) * 0.05
    params = (emb, wc, bc, wo, bo, wr, br, wl, bl)

    # batch.text is (seq_len, batch_size) of token ids.
    text = jax.random.randint(ks[9], (seq_len, batch_size), 0, vocab_size, jnp.int32)

    fwd = jax.jit(functools.partial(feedforward_lm_forward, window_size=window_size))
    out = jax.block_until_ready(fwd(text, params))

    ref = _reference_forward(text, params, window_size)
    assert out.shape == (seq_len, batch_size, vocab_size), out.shape
    assert jnp.allclose(out, ref, atol=2e-3, rtol=2e-3), "mismatch vs JAX reference"
    print("KERNEL_OK")
</pallas_src>

<mosaic_0001>
module attributes {stable_mosaic.version = 11 : i64} {
  func.func @_ffn_lm_kernel(%arg0: i32, %arg1: i32, %arg2: memref<256x128xbf16, #tpu.memory_space<vmem>>, %arg3: memref<128x256xbf16, #tpu.memory_space<vmem>>, %arg4: memref<1x256xf32, #tpu.memory_space<vmem>>, %arg5: memref<128x128xbf16, #tpu.memory_space<vmem>>, %arg6: memref<1x128xf32, #tpu.memory_space<vmem>>, %arg7: memref<128x512xbf16, #tpu.memory_space<vmem>>, %arg8: memref<1x512xf32, #tpu.memory_space<vmem>>, %arg9: memref<256x512xf32, #tpu.memory_space<vmem>>, %arg10: memref<256x128xbf16, #tpu.memory_space<vmem>>) attributes {dimension_semantics = [#tpu.dimension_semantics<parallel>, #tpu.dimension_semantics<arbitrary>], iteration_bounds = array<i64: 2, 1>, scalar_prefetch = 0 : i64, scratch_operands = 1 : i64, tpu.core_type = #tpu.core_type<tc>, window_params = [{transform_indices = @transform_0, window_bounds = array<i64: 256, 128>}, {pipeline_mode = #tpu.pipeline_mode<synchronous>, transform_indices = @transform_1, window_bounds = array<i64: 128, 256>}, {pipeline_mode = #tpu.pipeline_mode<synchronous>, transform_indices = @transform_2, window_bounds = array<i64: 1, 256>}, {pipeline_mode = #tpu.pipeline_mode<synchronous>, transform_indices = @transform_3, window_bounds = array<i64: 128, 128>}, {pipeline_mode = #tpu.pipeline_mode<synchronous>, transform_indices = @transform_4, window_bounds = array<i64: 1, 128>}, {transform_indices = @transform_5, window_bounds = array<i64: 128, 512>}, {transform_indices = @transform_6, window_bounds = array<i64: 1, 512>}, {transform_indices = @transform_7, window_bounds = array<i64: 256, 512>}]} {
    %c0_i32 = arith.constant 0 : i32
    %0 = arith.cmpi eq, %arg1, %c0_i32 : i32
    %1 = arith.extui %0 : i1 to i32
    %c0_i32_0 = arith.constant 0 : i32
    %2 = arith.cmpi ne, %1, %c0_i32_0 : i32
    scf.if %2 {
      %c0_8 = arith.constant 0 : index
      %c0_9 = arith.constant 0 : index
      %10 = vector.load %arg2[%c0_8, %c0_9] : memref<256x128xbf16, #tpu.memory_space<vmem>>, vector<256x128xbf16>
      %c0_10 = arith.constant 0 : index
      %c0_11 = arith.constant 0 : index
      %11 = vector.load %arg3[%c0_10, %c0_11] : memref<128x256xbf16, #tpu.memory_space<vmem>>, vector<128x256xbf16>
      %cst_12 = arith.constant dense<0.000000e+00> : vector<256x256xf32>
      %12 = tpu.matmul %10, %11, %cst_12 {dimension_numbers = #tpu.dot_dimension_numbers<[1], [0], [0], [1], [0, 0, 1, 1], [], []>} : vector<256x128xbf16>, vector<128x256xbf16>, vector<256x256xf32> -> vector<256x256xf32>
      %c0_13 = arith.constant 0 : index
      %c0_14 = arith.constant 0 : index
      %13 = vector.load %arg4[%c0_13, %c0_14] : memref<1x256xf32, #tpu.memory_space<vmem>>, vector<1x256xf32>
      %14 = vector.broadcast %13 : vector<1x256xf32> to vector<256x256xf32>
      %15 = arith.addf %12, %14 : vector<256x256xf32>
      %16 = vector.extract_strided_slice %15 {offsets = [0, 0], sizes = [256, 128], strides = [1, 1]} : vector<256x256xf32> to vector<256x128xf32>
      %cst_15 = arith.constant 0.000000e+00 : f32
      %17 = vector.broadcast %cst_15 : f32 to vector<256x128xf32>
      %18 = arith.maximumf %16, %17 : vector<256x128xf32>
      %19 = arith.truncf %18 : vector<256x128xf32> to vector<256x128xbf16>
      %20 = vector.extract_strided_slice %15 {offsets = [0, 128], sizes = [256, 128], strides = [1, 1]} : vector<256x256xf32> to vector<256x128xf32>
      %c0_16 = arith.constant 0 : index
      %c0_17 = arith.constant 0 : index
      %21 = vector.load %arg5[%c0_16, %c0_17] : memref<128x128xbf16, #tpu.memory_space<vmem>>, vector<128x128xbf16>
      %cst_18 = arith.constant dense<0.000000e+00> : vector<256x128xf32>
      %22 = tpu.matmul %19, %21, %cst_18 {dimension_numbers = #tpu.dot_dimension_numbers<[1], [0], [0], [1], [0, 0, 1, 1], [], []>} : vector<256x128xbf16>, vector<128x128xbf16>, vector<256x128xf32> -> vector<256x128xf32>
      %c0_19 = arith.constant 0 : index
      %c0_20 = arith.constant 0 : index
      %23 = vector.load %arg6[%c0_19, %c0_20] : memref<1x128xf32, #tpu.memory_space<vmem>>, vector<1x128xf32>
      %24 = vector.broadcast %23 : vector<1x128xf32> to vector<256x128xf32>
      %25 = arith.addf %22, %24 : vector<256x128xf32>
      %26 = arith.addf %25, %20 : vector<256x128xf32>
      %cst_21 = arith.constant 0.000000e+00 : f32
      %27 = vector.broadcast %cst_21 : f32 to vector<256x128xf32>
      %28 = arith.maximumf %26, %27 : vector<256x128xf32>
      %29 = arith.truncf %28 : vector<256x128xf32> to vector<256x128xbf16>
      %c0_22 = arith.constant 0 : index
      %c0_23 = arith.constant 0 : index
      %30 = vector.load %arg10[%c0_22, %c0_23] : memref<256x128xbf16, #tpu.memory_space<vmem>>, vector<256x128xbf16>
      tpu.vector_store %arg10[%c0_22, %c0_23], %29 {strides = array<i32>} : memref<256x128xbf16, #tpu.memory_space<vmem>>, vector<256x128xbf16>,
    } else {
    }
    %c0 = arith.constant 0 : index
    %c0_1 = arith.constant 0 : index
    %3 = vector.load %arg10[%c0, %c0_1] : memref<256x128xbf16, #tpu.memory_space<vmem>>, vector<256x128xbf16>
    %c0_2 = arith.constant 0 : index
    %c0_3 = arith.constant 0 : index
    %4 = vector.load %arg7[%c0_2, %c0_3] : memref<128x512xbf16, #tpu.memory_space<vmem>>, vector<128x512xbf16>
    %cst = arith.constant dense<0.000000e+00> : vector<256x512xf32>
    %5 = tpu.matmul %3, %4, %cst {dimension_numbers = #tpu.dot_dimension_numbers<[1], [0], [0], [1], [0, 0, 1, 1], [], []>} : vector<256x128xbf16>, vector<128x512xbf16>, vector<256x512xf32> -> vector<256x512xf32>
    %c0_4 = arith.constant 0 : index
    %c0_5 = arith.constant 0 : index
    %6 = vector.load %arg8[%c0_4, %c0_5] : memref<1x512xf32, #tpu.memory_space<vmem>>, vector<1x512xf32>
    %7 = vector.broadcast %6 : vector<1x512xf32> to vector<256x512xf32>
    %8 = arith.addf %5, %7 : vector<256x512xf32>
    %c0_6 = arith.constant 0 : index
    %c0_7 = arith.constant 0 : index
    %9 = vector.load %arg9[%c0_6, %c0_7] : memref<256x512xf32, #tpu.memory_space<vmem>>, vector<256x512xf32>
    tpu.vector_store %arg9[%c0_6, %c0_7], %8 {strides = array<i32>} : memref<256x512xf32, #tpu.memory_space<vmem>>, vector<256x512xf32>,
    return
  }
  func.func @transform_0(%arg0: i32, %arg1: i32) -> (i32, i32) {
    %c0_i32 = arith.constant 0 : i32
    %c0_i32_0 = arith.constant 0 : i32
    return %arg0, %c0_i32 : i32, i32
  }
  func.func @transform_1(%arg0: i32, %arg1: i32) -> (i32, i32) {
    %c0_i32 = arith.constant 0 : i32
    %c0_i32_0 = arith.constant 0 : i32
    %c0_i32_1 = arith.constant 0 : i32
    return %c0_i32, %c0_i32_0 : i32, i32
  }
  func.func @transform_2(%arg0: i32, %arg1: i32) -> (i32, i32) {
    %c0_i32 = arith.constant 0 : i32
    %c0_i32_0 = arith.constant 0 : i32
    %c0_i32_1 = arith.constant 0 : i32
    return %c0_i32, %c0_i32_0 : i32, i32
  }
  func.func @transform_3(%arg0: i32, %arg1: i32) -> (i32, i32) {
    %c0_i32 = arith.constant 0 : i32
    %c0_i32_0 = arith.constant 0 : i32
    %c0_i32_1 = arith.constant 0 : i32
    return %c0_i32, %c0_i32_0 : i32, i32
  }
  func.func @transform_4(%arg0: i32, %arg1: i32) -> (i32, i32) {
    %c0_i32 = arith.constant 0 : i32
    %c0_i32_0 = arith.constant 0 : i32
    %c0_i32_1 = arith.constant 0 : i32
    return %c0_i32, %c0_i32_0 : i32, i32
  }
  func.func @transform_5(%arg0: i32, %arg1: i32) -> (i32, i32) {
    %c0_i32 = arith.constant 0 : i32
    %c0_i32_0 = arith.constant 0 : i32
    return %c0_i32, %arg1 : i32, i32
  }
  func.func @transform_6(%arg0: i32, %arg1: i32) -> (i32, i32) {
    %c0_i32 = arith.constant 0 : i32
    %c0_i32_0 = arith.constant 0 : i32
    return %c0_i32, %arg1 : i32, i32
  }
  func.func @transform_7(%arg0: i32, %arg1: i32) -> (i32, i32) {
    %c0_i32 = arith.constant 0 : i32
    return %arg0, %arg1 : i32, i32
  }
}

</mosaic_0001>

<bundles_post_ra>
// kernel: feedforward_lm_forward.1
= control target key start
LH: loop header
LB: loop body
LE: loop exit
PB: predicated region body
PF: predicated region fallthrough
CT: control target
= control target key end

     0   :  { %s2806_s24 = smov 0   ;;  %s2808_s25 = smov 0   ;;  %s3571_s0 = inlined_call_operand.vmem [shape: bf16[512,128], index: 0, kind: input, shape index: {}]   ;;  %s3572_s1 = inlined_call_operand.vmem [shape: bf16[128,256], index: 1, kind: input, shape index: {}]   ;;  %s3573_s2 = inlined_call_operand.vmem [shape: f32[1,256], index: 2, kind: input, shape index: {}]   ;;  %s3574_s3 = inlined_call_operand.vmem [shape: bf16[128,128], index: 3, kind: input, shape index: {}]   ;;  %s3575_s4 = inlined_call_operand.vmem [shape: f32[1,128], index: 4, kind: input, shape index: {}]   ;;  %s3576_s5 = inlined_call_operand.vmem [shape: bf16[128,512], index: 5, kind: input, shape index: {}]   ;;  %s3577_s6 = inlined_call_operand.vmem [shape: f32[1,512], index: 6, kind: input, shape index: {}]   ;;  %s3578_s7 = inlined_call_operand.vmem [shape: f32[512,512], index: 7, kind: output, shape index: {}]  }
   0x1   :  { %s2810_s26 = smov 0  }
   0x2 LB: > { %s29_s27 = sadd.s32 1, %s2759_s25  ;;  %p2259_p0 = scmp.ge.s32.totalorder %s2763_s26, 1  ;;  %s2763_s26 = sphi %s2810_s26, %s17_s26   ;;  %s2759_s25 = sphi %s2808_s25, %s3580_s25   ;;  %s2755_s24 = sphi %s2806_s24, %s3579_s24  }
   0x3   : > { %p31_p1 = scmp.ge.s32.totalorder %s29_s27, 2  ;;  %p273_p2 = scmp.lt.s32.totalorder %s2763_s26, 3 }
   0x5   : > { %s3582_s27 = smov (%p31_p1, %s29_s27), 0  ;;  %p274_p3 = pnand %p2259_p0, %p273_p2 }
   0x6   : > { %s2260_s30 = sshll.u32 (!%p274_p3), %s2755_s24, 5 }
   0x7   : > { %277 = sbr.rel (%p274_p3) target bundleno = 794 (0x31a), region = 48  ;;  %p320_p4 = scmp.lt.s32.totalorder (!%p274_p3), %s2260_s30, 63 }
   0xc   : > { %v2629_v0 = vld [vmem:[%s3572_s1 + $0x74] ss:$8 sps:$4 sm:$0xff]   ;;  %v2631_v1 = vld [vmem:[%s3572_s1 + $0x70] ss:$8 sps:$4 sm:$0xff]   ;;  %v2765_v2 = vmov 0   ;;  %s3584_s30 = smov (!%p320_p4, %s2260_s30), 63  ;;  %v403_v41 = vlaneseq }
   0xd   : > { %621 = vmatprep.mubr.bf16.mxu0 %v2765_v2  ;;  %741 = vmatprep.mubr.bf16.mxu1 %v2765_v2  ;;  %v2632_v3 = vld [vmem:[%s3572_s1 + $0x64] ss:$8 sps:$4 sm:$0xff]   ;;  %v2634_v4 = vld [vmem:[%s3572_s1 + $0x60] ss:$8 sps:$4 sm:$0xff]   ;;  %v2635_v5 = vld [vmem:[%s3572_s1 + $0x54] ss:$8 sps:$4 sm:$0xff]  }
   0xe   : > { %589 = vmatprep.subr.bf16.mxu0 %v2629_v0  ;;  %2588 = vmatprep.subr.bf16.mxu1 %v2629_v0  ;;  %s2261_s16 = sshll.u32 %s3584_s30, 2  ;;  %v2637_v6 = vld [vmem:[%s3572_s1 + $0x50] ss:$8 sps:$4 sm:$0xff]   ;;  %v2638_v7 = vld [vmem:[%s3572_s1 + $0x44] ss:$8 sps:$4 sm:$0xff]   ;;  %v2952_v47 = vshrl.u32 %v403_v41, 7 }
   0xf   : > { %590 = vmatpush1.bf16.msra.mxu0 %v2631_v1  ;;  %2596 = vmatpush1.bf16.msra.mxu1 %v2631_v1  ;;  %s2853_s23 = scalar_lea.vmem %s3571_s0, %s2261_s16  ;;  %v2640_v8 = vld [vmem:[%s3572_s1 + $0x40] ss:$8 sps:$4 sm:$0xff]   ;;  %v2641_v9 = vld [vmem:[%s3572_s1 + $0x34] ss:$8 sps:$4 sm:$0xff]   ;;  %v2643_v10 = vld [vmem:[%s3572_s1 + $0x30] ss:$8 sps:$4 sm:$0xff]  }
  0x10   : > { %591 = vmatprep.subr.bf16.mxu0 %v2632_v3  ;;  %2589 = vmatprep.subr.bf16.mxu1 %v2632_v3  ;;  %v2644_v11 = vld [vmem:[%s3572_s1 + $0x24] ss:$8 sps:$4 sm:$0xff]   ;;  %v2646_v12 = vld [vmem:[%s3572_s1 + $0x20] ss:$8 sps:$4 sm:$0xff]   ;;  %v2647_v13 = vld [vmem:[%s3572_s1 + $0x14] ss:$8 sps:$4 sm:$0xff]  }
  0x11   : > { %v2649_v14 = vld [vmem:[%s3572_s1 + $0x10] ss:$8 sps:$4 sm:$0xff]   ;;  %v2650_v15 = vld [vmem:[%s3572_s1 + $0x4] ss:$8 sps:$4 sm:$0xff]   ;;  %v2652_v16 = vld [vmem:[%s3572_s1] ss:$8 sps:$4 sm:$0xff]  }
  0x12   : > { %v2669_v17 = vld [vmem:[%s3574_s3 + $0x38] sm:$0xff]   ;;  %v2653_v18 = vld [vmem:[%s2853_s23] sm:$0xff]   ;;  %v2670_v20 = vld [vmem:[%s3574_s3 + $0x30] sm:$0xff]   ;;  %v405_v50 = vsub.s32 0, %v2952_v47  ;;  %s2388_s15 = sshll.u32 %s3584_s30, 5 }
  0x13   : > { %592 = vmatpush1.bf16.msra.mxu0 %v2634_v4  ;;  %2597 = vmatpush1.bf16.msra.mxu1 %v2634_v4  ;;  %v2664_v19 = vld [vmem:[%s2853_s23 + $0x60] sm:$0xff]   ;;  %v2671_v21 = vld [vmem:[%s3574_s3 + $0x28] sm:$0xff]   ;;  %v2655_v25 = vld [vmem:[%s2853_s23 + $0x10] sm:$0xff]   ;;  %s3304_s18 = scalar_lea.vmem %s3578_s7, %s2388_s15 }
  0x14   : > { %593 = vmatprep.subr.bf16.mxu0 %v2635_v5  ;;  %2590 = vmatprep.subr.bf16.mxu1 %v2635_v5  ;;  %v2654_v22 = vld [vmem:[%s2853_s23 + $0x8] sm:$0xff]   ;;  %v2672_v24 = vld [vmem:[%s3574_s3 + $0x20] sm:$0xff]   ;;  %v2667_v26 = vld [vmem:[%s2853_s23 + $0x70] sm:$0xff]  }
  0x15   : > { %v2666_v23 = vld [vmem:[%s2853_s23 + $0x68] sm:$0xff]   ;;  %v2656_v27 = vld [vmem:[%s2853_s23 + $0x18] sm:$0xff]   ;;  %v2657_v29 = vld [vmem:[%s2853_s23 + $0x20] sm:$0xff]  }
  0x16   : > { %v2668_v28 = vld [vmem:[%s2853_s23 + $0x78] sm:$0xff]   ;;  %v2658_v30 = vld [vmem:[%s2853_s23 + $0x28] sm:$0xff]   ;;  %v2659_v31 = vld [vmem:[%s2853_s23 + $0x30] sm:$0xff]  }
  0x17   : > { %594 = vmatpush1.bf16.msra.mxu0 %v2637_v6  ;;  %2598 = vmatpush1.bf16.msra.mxu1 %v2637_v6  ;;  %v2660_v32 = vld [vmem:[%s2853_s23 + $0x38] sm:$0xff]   ;;  %v2661_v33 = vld [vmem:[%s2853_s23 + $0x40] sm:$0xff]   ;;  %v2662_v35 = vld [vmem:[%s2853_s23 + $0x48] sm:$0xff]  }
  0x18   : > { %595 = vmatprep.subr.bf16.mxu0 %v2638_v7  ;;  %2591 = vmatprep.subr.bf16.mxu1 %v2638_v7  ;;  %v2673_v34 = vld [vmem:[%s3574_s3 + $0x18] sm:$0xff]   ;;  %v2674_v36 = vld [vmem:[%s3574_s3 + $0x10] sm:$0xff]   ;;  %v2675_v37 = vld [vmem:[%s3574_s3 + $0x8] sm:$0xff]  }
  0x19   : > { %v2663_v38 = vld [vmem:[%s2853_s23 + $0x50] sm:$0xff]   ;;  %v2676_v39 = vld [vmem:[%s3574_s3] sm:$0xff]   ;;  %v2665_v40 = vld [vmem:[%s2853_s23 + $0x58] sm:$0xff]  }
  0x1a   : > { %v2677_v42 = vld [vmem:[%s3576_s5 + $0xe8] ss:$16 sps:$4 sm:$0xff]   ;;  %v2679_v43 = vld [vmem:[%s3576_s5 + $0xec] ss:$16 sps:$4 sm:$0xff]   ;;  %v2688_v45 = vld [vmem:[%s3576_s5 + $0xe4] ss:$16 sps:$4 sm:$0xff]  }
  0x1b   : > { %596 = vmatpush1.bf16.msra.mxu0 %v2640_v8  ;;  %2599 = vmatpush1.bf16.msra.mxu1 %v2640_v8  ;;  %v2682_v44 = vld [vmem:[%s3576_s5 + $0xcc] ss:$16 sps:$4 sm:$0xff]   ;;  %v2680_v46 = vld [vmem:[%s3576_s5 + $0xc8] ss:$16 sps:$4 sm:$0xff]   ;;  %v2967_v52 = vld [vmem:[%s3573_s2] sm:$0x3] }
  0x1c   : > { %597 = vmatprep.subr.bf16.mxu0 %v2641_v9  ;;  %2592 = vmatprep.subr.bf16.mxu1 %v2641_v9  ;;  %v2685_v48 = vld [vmem:[%s3576_s5 + $0xac] ss:$16 sps:$4 sm:$0xff]   ;;  %v2683_v49 = vld [vmem:[%s3576_s5 + $0xa8] ss:$16 sps:$4 sm:$0xff]   ;;  %v2975_v54 = vrot.slane %v2967_v52, %v405_v50 }
  0x1d   : > { %v2691_v51 = vld [vmem:[%s3576_s5 + $0x8c] ss:$16 sps:$4 sm:$0xff]   ;;  %v2689_v53 = vld [vmem:[%s3576_s5 + $0x88] ss:$16 sps:$4 sm:$0xff]  }
  0x1e   : > { %v2700_v55 = vld [vmem:[%s3576_s5 + $0x6c] ss:$16 sps:$4 sm:$0xff]   ;;  %v2698_v58 = vld [vmem:[%s3576_s5 + $0x68] ss:$16 sps:$4 sm:$0xff]  }
  0x1f   : > { %598 = vmatpush1.bf16.msra.mxu0 %v2643_v10  ;;  %2600 = vmatpush1.bf16.msra.mxu1 %v2643_v10  ;;  %v2706_v60 = vld [vmem:[%s3576_s5 + $0x4c] ss:$16 sps:$4 sm:$0xff]   ;;  %v2704_v0 = vld [vmem:[%s3576_s5 + $0x48] ss:$16 sps:$4 sm:$0xff]  }
  0x20   : > { %599 = vmatprep.subr.bf16.mxu0 %v2644_v11  ;;  %2593 = vmatprep.subr.bf16.mxu1 %v2644_v11 }
  0x23   : > { %600 = vmatpush1.bf16.msra.mxu0 %v2646_v12  ;;  %2601 = vmatpush1.bf16.msra.mxu1 %v2646_v12 }
  0x24   : > { %601 = vmatprep.subr.bf16.mxu0 %v2647_v13  ;;  %2594 = vmatprep.subr.bf16.mxu1 %v2647_v13 }
  0x27   : > { %602 = vmatpush1.bf16.msra.mxu0 %v2649_v14  ;;  %2602 = vmatpush1.bf16.msra.mxu1 %v2649_v14  ;;  %v2686_v14 = vld [vmem:[%s3576_s5 + $0xe0] ss:$16 sps:$4 sm:$0xff]  }
  0x28   : > { %603 = vmatprep.subr.bf16.mxu0 %v2650_v15  ;;  %2595 = vmatprep.subr.bf16.mxu1 %v2650_v15 }
  0x2b   : > { %604 = vmatpush1.bf16.msra.mxu0 %v2652_v16  ;;  %2603 = vmatpush1.bf16.msra.mxu1 %v2652_v16  ;;  %v2694_v16 = vld [vmem:[%s3576_s5 + $0xc4] ss:$16 sps:$4 sm:$0xff]  }
  0x2c   : > { %2540 = vmatprep.subr.bf16.mxu1 %v2669_v17  ;;  %1821 = vmatprep.subr.bf16.mxu0 %v2679_v43 }
  0x2e   : > { %622 = vmatmul.mubr.bf16.vlgmr.msra.gmra.mxu0 %v2653_v18  ;;  %742 = vmatmul.mubr.bf16.vlgmr.msra.gmra.mxu1 %v2664_v19 }
  0x2f   : > { %631 = vmatprep.mubr.bf16.mxu0 %v2765_v2  ;;  %751 = vmatprep.mubr.bf16.mxu1 %v2765_v2 }
  0x30   : > { %2541 = vmatpush3.bf16.msra.mxu1 %v2669_v17  ;;  %1822 = vmatpush1.bf16.msra.mxu0 %v2677_v42 }
  0x31   : > { %2542 = vmatprep.subr.bf16.mxu1 %v2670_v20  ;;  %1823 = vmatprep.subr.bf16.mxu0 %v2682_v44 }
  0x34   : > { %2543 = vmatpush3.bf16.msra.mxu1 %v2670_v20  ;;  %1824 = vmatpush1.bf16.msra.mxu0 %v2680_v46  ;;  %v2692_v20 = vld [vmem:[%s3576_s5 + $0xc0] ss:$16 sps:$4 sm:$0xff]  }
  0x35   : > { %2544 = vmatprep.subr.bf16.mxu1 %v2671_v21  ;;  %1825 = vmatprep.subr.bf16.mxu0 %v2685_v48 }
  0x36   : > { %632 = vmatmul.mubr.bf16.gmra.mxu0 %v2654_v22  ;;  %752 = vmatmul.mubr.bf16.gmra.mxu1 %v2666_v23  ;;  %v2697_v22 = vld [vmem:[%s3576_s5 + $0xa4] ss:$16 sps:$4 sm:$0xff]  }
  0x37   : > { %641 = vmatprep.mubr.bf16.mxu0 %v2765_v2  ;;  %761 = vmatprep.mubr.bf16.mxu1 %v2765_v2 }
  0x38   : > { %2545 = vmatpush3.bf16.msra.mxu1 %v2671_v21  ;;  %1826 = vmatpush1.bf16.msra.mxu0 %v2683_v49 }
  0x39   : > { %2546 = vmatprep.subr.bf16.mxu1 %v2672_v24  ;;  %1827 = vmatprep.subr.bf16.mxu0 %v2691_v51 }
  0x3c   : > { %2547 = vmatpush3.bf16.msra.mxu1 %v2672_v24  ;;  %1828 = vmatpush1.bf16.msra.mxu0 %v2689_v53 }
  0x3d   : > { %2548 = vmatprep.subr.bf16.mxu1 %v2673_v34  ;;  %1829 = vmatprep.subr.bf16.mxu0 %v2700_v55 }
  0x3e   : > { %642 = vmatmul.mubr.bf16.gmra.mxu0 %v2655_v25  ;;  %762 = vmatmul.mubr.bf16.gmra.mxu1 %v2667_v26 }
  0x3f   : > { %651 = vmatprep.mubr.bf16.mxu0 %v2765_v2  ;;  %771 = vmatprep.mubr.bf16.mxu1 %v2765_v2 }
  0x40   : > { %2549 = vmatpush3.bf16.msra.mxu1 %v2673_v34  ;;  %1830 = vmatpush1.bf16.msra.mxu0 %v2698_v58 }
  0x41   : > { %2550 = vmatprep.subr.bf16.mxu1 %v2674_v36  ;;  %1831 = vmatprep.subr.bf16.mxu0 %v2706_v60 }
  0x44   : > { %2551 = vmatpush3.bf16.msra.mxu1 %v2674_v36  ;;  %1832 = vmatpush1.bf16.msra.mxu0 %v2704_v0 }
  0x45   : > { %2552 = vmatprep.subr.bf16.mxu1 %v2675_v37 }
  0x46   : > { %652 = vmatmul.mubr.bf16.gmra.mxu0 %v2656_v27  ;;  %772 = vmatmul.mubr.bf16.gmra.mxu1 %v2668_v28  ;;  %v2695_v27 = vld [vmem:[%s3576_s5 + $0xa0] ss:$16 sps:$4 sm:$0xff]  }
  0x47   : > { %661 = vmatprep.mubr.bf16.mxu0 %v2765_v2 }
  0x48   : > { %2553 = vmatpush3.bf16.msra.mxu1 %v2675_v37 }
  0x49   : > { %2554 = vmatprep.subr.bf16.mxu1 %v2676_v39 }
  0x4c   : > { %2555 = vmatpush3.bf16.msra.mxu1 %v2676_v39 }
  0x4d   : > { %1628 = vmatprep.subr.bf16.mxu1 %v2688_v45 }
  0x4e   : > { %662 = vmatmul.mubr.bf16.gmra.mxu0 %v2657_v29  ;;  %v2703_v29 = vld [vmem:[%s3576_s5 + $0x84] ss:$16 sps:$4 sm:$0xff]  }
  0x4f   : > { %671 = vmatprep.mubr.bf16.mxu0 %v2765_v2 }
  0x56   : > { %672 = vmatmul.mubr.bf16.gmra.mxu0 %v2658_v30 }
  0x57   : > { %681 = vmatprep.mubr.bf16.mxu0 %v2765_v2 }
  0x5e   : > { %682 = vmatmul.mubr.bf16.gmra.mxu0 %v2659_v31 }
  0x5f   : > { %691 = vmatprep.mubr.bf16.mxu0 %v2765_v2 }
  0x66   : > { %692 = vmatmul.mubr.bf16.gmra.mxu0 %v2660_v32 }
  0x67   : > { %701 = vmatprep.mubr.bf16.mxu0 %v2765_v2 }
  0x6e   : > { %702 = vmatmul.mubr.bf16.gmra.mxu0 %v2661_v33  ;;  %v2701_v33 = vld [vmem:[%s3576_s5 + $0x80] ss:$16 sps:$4 sm:$0xff]  }
  0x6f   : > { %711 = vmatprep.mubr.bf16.mxu0 %v2765_v2 }
  0x76   : > { %712 = vmatmul.mubr.bf16.gmra.mxu0 %v2662_v35  ;;  %v2709_v35 = vld [vmem:[%s3576_s5 + $0x64] ss:$16 sps:$4 sm:$0xff]  }
  0x77   : > { %721 = vmatprep.mubr.bf16.mxu0 %v2765_v2 }
  0x7e   : > { %722 = vmatmul.mubr.bf16.gmra.mxu0 %v2663_v38 }
  0x7f   : > { %731 = vmatprep.mubr.bf16.mxu0 %v2765_v2 }
  0x86   : > { %732 = vmatmul.mubr.bf16.gmra.mxu0 %v2665_v40  ;;  %v2707_v40 = vld [vmem:[%s3576_s5 + $0x60] ss:$16 sps:$4 sm:$0xff]  }
  0x87   : > { %1853 = vmatprep.mubr.bf16.mxu0 %v2765_v2 }
  0xee   : > { %v623_v56 = vpop.f32.mrf.mxu0 }
  0xef   : > { %v624_v59 = vadd.f32 %v623_v56, %v2975_v54 }
  0xf0   : > { %v2980_v57 = vpop.f32.mrf.mxu0 }
  0xf1   : > { %v782_v1 = vmax.f32 %v624_v59, 0.0  ;;  %v3049_v59 = vpop.f32.mrf.mxu1 }
  0xf2   : > { %v627_v61 = vpop.f32.mrf.mxu0 }
  0xf3   : > { %v628_v62 = vadd.f32 %v627_v61, %v2975_v54 }
  0xf4   : > { %v2990_v63 = vpop.f32.mrf.mxu0 }
  0xf5   : > { %v783_v3 = vmax.f32 %v628_v62, 0.0 }
  0xf6   : > { %v633_v4 = vpop.f32.mrf.mxu0 }
  0xf7   : > { %v814_v5 = vpack.c.bf16 %v783_v3, %v782_v1  ;;  %v634_v7 = vadd.f32 %v633_v4, %v2975_v54  ;;  %v3054_v3 = vpop.f32.mrf.mxu1 }
  0xf8   : > { %v2995_v6 = vpop.f32.mrf.mxu0 }
  0xf9   : > { %2556 = vmatprep.mubr.bf16.mxu1 %v814_v5  ;;  %v784_v11 = vmax.f32 %v634_v7, 0.0 }
  0xfa   : > { %v637_v8 = vpop.f32.mrf.mxu0 }
  0xfb   : > { %v638_v9 = vadd.f32 %v637_v8, %v2975_v54 }
  0xfc   : > { %v2999_v10 = vpop.f32.mrf.mxu0 }
  0xfd   : > { %v785_v12 = vmax.f32 %v638_v9, 0.0  ;;  %v747_v9 = vpop.f32.mrf.mxu1 }
  0xfe   : > { %v643_v13 = vpop.f32.mrf.mxu0 }
  0xff   : > { %v815_v15 = vpack.c.bf16 %v785_v12, %v784_v11  ;;  %v644_v18 = vadd.f32 %v643_v13, %v2975_v54 }
 0x100   : > { %v3007_v17 = vpop.f32.mrf.mxu0 }
 0x101   : > { %2557 = vmatmul.mubr.bf16.vlgmr.msra.gmra.mxu1 %v815_v15  ;;  %v786_v24 = vmax.f32 %v644_v18, 0.0 }
 0x102   : > { %v647_v19 = vpop.f32.mrf.mxu0  ;;  %1629 = vmatpush1.bf16.msra.mxu1 %v2686_v14 }
 0x103   : > { %v648_v21 = vadd.f32 %v647_v19, %v2975_v54  ;;  %1630 = vmatprep.subr.bf16.mxu1 %v2694_v16  ;;  %v3062_v16 = vpop.f32.mrf.mxu1 }
 0x104   : > { %v3017_v23 = vpop.f32.mrf.mxu0 }
 0x105   : > { %v787_v25 = vmax.f32 %v648_v21, 0.0 }
 0x106   : > { %v653_v26 = vpop.f32.mrf.mxu0  ;;  %1631 = vmatpush1.bf16.msra.mxu1 %v2692_v20 }
 0x107   : > { %v816_v28 = vpack.c.bf16 %v787_v25, %v786_v24  ;;  %1632 = vmatprep.subr.bf16.mxu1 %v2697_v22  ;;  %v654_v31 = vadd.f32 %v653_v26, %v2975_v54  ;;  %v3067_v22 = vpop.f32.mrf.mxu1 }
 0x108   : > { %v3025_v30 = vpop.f32.mrf.mxu0 }
 0x109   : > { %2560 = vmatprep.mubr.bf16.mxu1 %v816_v28  ;;  %v788_v37 = vmax.f32 %v654_v31, 0.0 }
 0x10a   : > { %v657_v32 = vpop.f32.mrf.mxu0  ;;  %1633 = vmatpush1.bf16.msra.mxu1 %v2695_v27 }
 0x10b   : > { %v658_v34 = vadd.f32 %v657_v32, %v2975_v54  ;;  %1634 = vmatprep.subr.bf16.mxu1 %v2703_v29  ;;  %v3072_v29 = vpop.f32.mrf.mxu1 }
 0x10c   : > { %v3035_v36 = vpop.f32.mrf.mxu0 }
 0x10d   : > { %v789_v38 = vmax.f32 %v658_v34, 0.0 }
 0x10e   : > { %v663_v39 = vpop.f32.mrf.mxu0  ;;  %1635 = vmatpush1.bf16.msra.mxu1 %v2701_v33 }
 0x10f   : > { %v817_v41 = vpack.c.bf16 %v789_v38, %v788_v37  ;;  %1636 = vmatprep.subr.bf16.mxu1 %v2709_v35  ;;  %v664_v43 = vadd.f32 %v663_v39, %v2975_v54  ;;  %v757_v35 = vpop.f32.mrf.mxu1 }
 0x110   : > { %v3040_v42 = vpop.f32.mrf.mxu0 }
 0x111   : > { %2561 = vmatmul.mubr.bf16.gmra.mxu1 %v817_v41  ;;  %v790_v48 = vmax.f32 %v664_v43, 0.0  ;;  %v3080_v43 = vpop.f32.mrf.mxu1 }
 0x112   : > { %v667_v44 = vpop.f32.mrf.mxu0  ;;  %1637 = vmatpush1.bf16.msra.mxu1 %v2707_v40 }
 0x113   : > { %v668_v45 = vadd.f32 %v667_v44, %v2975_v54 }
 0x114   : > { %v3044_v46 = vpop.f32.mrf.mxu0 }
 0x115   : > { %v791_v49 = vmax.f32 %v668_v45, 0.0 }
 0x116   : > { %v673_v51 = vpop.f32.mrf.mxu0 }
 0x117   : > { %v818_v53 = vpack.c.bf16 %v791_v49, %v790_v48  ;;  %v674_v56 = vadd.f32 %v673_v51, %v2975_v54  ;;  %v763_v51 = vpop.f32.mrf.mxu1 }
 0x118   : > { %v3046_v55 = vpop.f32.mrf.mxu0 }
 0x119   : > { %2564 = vmatprep.mubr.bf16.mxu1 %v818_v53  ;;  %v792_v62 = vmax.f32 %v674_v56, 0.0 }
 0x11a   : > { %v677_v58 = vpop.f32.mrf.mxu0 }
 0x11b   : > { %v678_v60 = vadd.f32 %v677_v58, %v2975_v54 }
 0x11c   : > { %v3052_v61 = vpop.f32.mrf.mxu0 }
 0x11d   : > { %v793_v0 = vmax.f32 %v678_v60, 0.0 }
 0x11e   : > { %v683_v1 = vpop.f32.mrf.mxu0 }
 0x11f   : > { %v819_v4 = vpack.c.bf16 %v793_v0, %v792_v62  ;;  %v684_v7 = vadd.f32 %v683_v1, %v2975_v54  ;;  %v3088_v0 = vpop.f32.mrf.mxu1 }
 0x120   : > { %v3056_v5 = vpop.f32.mrf.mxu0 }
 0x121   : > { %2565 = vmatmul.mubr.bf16.gmra.mxu1 %v819_v4  ;;  %v794_v13 = vmax.f32 %v684_v7, 0.0 }
 0x122   : > { %v687_v8 = vpop.f32.mrf.mxu0 }
 0x123   : > { %v688_v11 = vadd.f32 %v687_v8, %v2975_v54 }
 0x124   : > { %v3060_v12 = vpop.f32.mrf.mxu0 }
 0x125   : > { %v795_v14 = vmax.f32 %v688_v11, 0.0  ;;  %v767_v11 = vpop.f32.mrf.mxu1 }
 0x126   : > { %v693_v15 = vpop.f32.mrf.mxu0 }
 0x127   : > { %v820_v18 = vpack.c.bf16 %v795_v14, %v794_v13  ;;  %v694_v20 = vadd.f32 %v693_v15, %v2975_v54 }
 0x128   : > { %v3064_v19 = vpop.f32.mrf.mxu0 }
 0x129   : > { %2568 = vmatprep.mubr.bf16.mxu1 %v820_v18  ;;  %v796_v26 = vmax.f32 %v694_v20, 0.0  ;;  %v744_v20 = vadd.f32 %v3049_v59, %v2975_v54  ;;  %v2715_v59 = vld [vmem:[%s3576_s5 + $0x2c] ss:$16 sps:$4 sm:$0xff]  }
 0x12a   : > { %v697_v21 = vpop.f32.mrf.mxu0  ;;  %1833 = vmatprep.subr.bf16.mxu0 %v2715_v59 }
 0x12b   : > { %v698_v24 = vadd.f32 %v697_v21, %v2975_v54  ;;  %v748_v21 = vadd.f32 %v747_v9, %v2975_v54 }
 0x12c   : > { %v3070_v25 = vpop.f32.mrf.mxu0 }
 0x12d   : > { %v797_v27 = vmax.f32 %v698_v24, 0.0 }
 0x12e   : > { %v703_v28 = vpop.f32.mrf.mxu0 }
 0x12f   : > { %v821_v31 = vpack.c.bf16 %v797_v27, %v796_v26  ;;  %v704_v33 = vadd.f32 %v703_v28, %v2975_v54  ;;  %v3099_v26 = vpop.f32.mrf.mxu1  ;;  %v2710_v27 = vld [vmem:[%s3576_s5 + $0x40] ss:$16 sps:$4 sm:$0xff]   ;;  %v2712_v28 = vld [vmem:[%s3576_s5 + $0x44] ss:$16 sps:$4 sm:$0xff]  }
 0x130   : > { %v3074_v32 = vpop.f32.mrf.mxu0  ;;  %1638 = vmatprep.subr.bf16.mxu1 %v2712_v28 }
 0x131   : > { %2569 = vmatmul.mubr.bf16.gmra.mxu1 %v821_v31  ;;  %v798_v39 = vmax.f32 %v704_v33, 0.0  ;;  %v2713_v31 = vld [vmem:[%s3576_s5 + $0x28] ss:$16 sps:$4 sm:$0xff]  }
 0x132   : > { %v707_v34 = vpop.f32.mrf.mxu0  ;;  %1639 = vmatpush1.bf16.msra.mxu1 %v2710_v27  ;;  %1834 = vmatpush1.bf16.msra.mxu0 %v2713_v31  ;;  %v2722_v27 = vld [vmem:[%s3576_s5] ss:$16 sps:$4 sm:$0xff]  }
 0x133   : > { %v708_v37 = vadd.f32 %v707_v34, %v2975_v54 }
 0x134   : > { %v3078_v38 = vpop.f32.mrf.mxu0 }
 0x135   : > { %v799_v40 = vmax.f32 %v708_v37, 0.0  ;;  %v806_v37 = vmax.f32 %v744_v20, 0.0 }
 0x136   : > { %v713_v41 = vpop.f32.mrf.mxu0 }
 0x137   : > { %v822_v44 = vpack.c.bf16 %v799_v40, %v798_v39  ;;  %v714_v48 = vadd.f32 %v713_v41, %v2975_v54  ;;  %v807_v39 = vmax.f32 %v748_v21, 0.0  ;;  %v773_v41 = vpop.f32.mrf.mxu1 }
 0x138   : > { %v3082_v45 = vpop.f32.mrf.mxu0  ;;  %v774_v31 = vadd.f32 %v773_v41, %v2975_v54  ;;  %v3151_v41 = vld [vmem:[%s3575_s4] ss:$0 sm:$0xff] }
 0x139   : > { %2572 = vmatprep.mubr.bf16.mxu1 %v822_v44  ;;  %v800_v58 = vmax.f32 %v714_v48, 0.0 }
 0x13a   : > { %v717_v49 = vpop.f32.mrf.mxu0 }
 0x13b   : > { %v718_v53 = vadd.f32 %v717_v49, %v2975_v54  ;;  %v754_v49 = vadd.f32 %v3067_v22, %v2975_v54  ;;  %v2719_v22 = vld [vmem:[%s3576_s5 + $0x8] ss:$16 sps:$4 sm:$0xff]  }
 0x13c   : > { %v3086_v56 = vpop.f32.mrf.mxu0 }
 0x13d   : > { %v801_v60 = vmax.f32 %v718_v53, 0.0 }
 0x13e   : > { %v723_v62 = vpop.f32.mrf.mxu0 }
 0x13f   : > { %v823_v1 = vpack.c.bf16 %v801_v60, %v800_v58  ;;  %v724_v7 = vadd.f32 %v723_v62, %v2975_v54  ;;  %v758_v58 = vadd.f32 %v757_v35, %v2975_v54  ;;  %v826_v60 = vpack.c.bf16 %v807_v39, %v806_v37  ;;  %v2721_v35 = vld [vmem:[%s3576_s5 + $0xc] ss:$16 sps:$4 sm:$0xff]  }
 0x140   : > { %v3090_v4 = vpop.f32.mrf.mxu0  ;;  %v764_v62 = vadd.f32 %v763_v51, %v2975_v54  ;;  %v808_v51 = vmax.f32 %v754_v49, 0.0  ;;  %1835 = vmatprep.subr.bf16.mxu0 %v2721_v35 }
 0x141   : > { %2573 = vmatmul.mubr.bf16.gmra.mxu1 %v823_v1  ;;  %v802_v15 = vmax.f32 %v724_v7, 0.0  ;;  %v768_v1 = vadd.f32 %v767_v11, %v2975_v54  ;;  %v3122_v7 = vpop.f32.mrf.mxu1  ;;  %v809_v11 = vmax.f32 %v758_v58, 0.0  ;;  %1836 = vmatpush1.bf16.msra.mxu0 %v2719_v22 }
 0x142   : > { %v727_v8 = vpop.f32.mrf.mxu0 }
 0x143   : > { %v728_v13 = vadd.f32 %v727_v8, %v2975_v54  ;;  %v811_v20 = vmax.f32 %v768_v1, 0.0  ;;  %v777_v21 = vpop.f32.mrf.mxu1  ;;  %v827_v28 = vpack.c.bf16 %v809_v11, %v808_v51 }
 0x144   : > { %v3094_v14 = vpop.f32.mrf.mxu0 }
 0x145   : > { %v803_v18 = vmax.f32 %v728_v13, 0.0  ;;  %v2718_v13 = vld [vmem:[%s3576_s5 + $0x24] ss:$16 sps:$4 sm:$0xff]  }
 0x146   : > { %v733_v24 = vpop.f32.mrf.mxu0  ;;  %1640 = vmatprep.subr.bf16.mxu1 %v2718_v13 }
 0x147   : > { %v824_v33 = vpack.c.bf16 %v803_v18, %v802_v15  ;;  %v734_v34 = vadd.f32 %v733_v24, %v2975_v54  ;;  %v2716_v15 = vld [vmem:[%s3576_s5 + $0x20] ss:$16 sps:$4 sm:$0xff]   ;;  %v810_v18 = vmax.f32 %v764_v62, 0.0  ;;  %v2724_v24 = vld [vmem:[%s3576_s5 + $0x4] ss:$16 sps:$4 sm:$0xff]  }
 0x148   : > { %v3113_v9 = vpop.f32.mrf.mxu0  ;;  %1641 = vmatpush1.bf16.msra.mxu1 %v2716_v15 }
 0x149   : > { %2576 = vmatprep.mubr.bf16.mxu1 %v824_v33  ;;  %v804_v48 = vmax.f32 %v734_v34, 0.0  ;;  %v778_v33 = vadd.f32 %v777_v21, %v2975_v54  ;;  %1642 = vmatprep.subr.bf16.mxu1 %v2724_v24  ;;  %v828_v59 = vpack.c.bf16 %v811_v20, %v810_v18  ;;  %v812_v34 = vmax.f32 %v774_v31, 0.0 }
 0x14a   : > { %v737_v40 = vpop.f32.mrf.mxu0 }
 0x14b   : > { %v738_v44 = vadd.f32 %v737_v40, %v2975_v54  ;;  %v813_v37 = vmax.f32 %v778_v33, 0.0  ;;  %v409_v40 = vsub.s32 1, %v2952_v47 }
 0x14c   : > { %1643 = vmatpush1.bf16.msra.mxu1 %v2722_v27 }
 0x14d   : > { %v805_v53 = vmax.f32 %v738_v44, 0.0  ;;  %v829_v39 = vpack.c.bf16 %v813_v37, %v812_v34  ;;  %v3146_v44 = vpop.f32.mrf.mxu1 }
 0x14f   : > { %v825_v8 = vpack.c.bf16 %v805_v53, %v804_v48  ;;  %v3156_v48 = vrot.slane %v2967_v52, %v409_v40 }
 0x151   : > { %2577 = vmatmul.mubr.bf16.gmra.mxu1 %v825_v8  ;;  %v636_v58 = vadd.f32 %v2995_v6, %v3156_v48  ;;  %v626_v1 = vadd.f32 %v2980_v57, %v3156_v48  ;;  %v640_v8 = vadd.f32 %v2999_v10, %v3156_v48  ;;  %v630_v22 = vadd.f32 %v2990_v63, %v3156_v48 }
 0x152   : > { %2580 = vmatprep.mubr.bf16.mxu1 %v826_v60  ;;  %v656_v63 = vadd.f32 %v3025_v30, %v3156_v48  ;;  %v646_v34 = vadd.f32 %v3007_v17, %v3156_v48  ;;  %v660_v37 = vadd.f32 %v3035_v36, %v3156_v48 }
 0x159   : > { %2581 = vmatmul.mubr.bf16.gmra.mxu1 %v827_v28 }
 0x15a   : > { %2584 = vmatprep.mubr.bf16.mxu1 %v828_v59 }
 0x161   : > { %2585 = vmatmul.mubr.bf16.gmra.mxu1 %v829_v39 }
 0x162   : > { %1660 = vmatprep.mubr.bf16.mxu1 %v2765_v2 }
 0x1c1   : > { %v2558_v54 = vpop.f32.mrf.mxu1 }
 0x1c2   : > { %v944_v49 = vadd.f32 %v2558_v54, %v3151_v41 }
 0x1c3   : > { %v935_v53 = vpop.f32.mrf.mxu1 }
 0x1c4   : > { %v936_v60 = vadd.f32 %v3151_v41, %v935_v53  ;;  %v1064_v13 = vadd.f32 %v944_v49, %v636_v58  ;;  %v650_v58 = vadd.f32 %v3017_v23, %v3156_v48 }
 0x1c5   : > { %v2559_v62 = vpop.f32.mrf.mxu1 }
 0x1c6   : > { %v947_v15 = vadd.f32 %v2559_v62, %v3151_v41  ;;  %v1062_v35 = vadd.f32 %v936_v60, %v626_v1  ;;  %v1096_v11 = vmax.f32 %v1064_v13, 0.0 }
 0x1c7   : > { %v938_v52 = vpop.f32.mrf.mxu1 }
 0x1c8   : > { %v1065_v51 = vadd.f32 %v947_v15, %v640_v8  ;;  %v939_v6 = vadd.f32 %v3151_v41, %v938_v52  ;;  %v1094_v21 = vmax.f32 %v1062_v35, 0.0 }
 0x1ca   : > { %v1097_v18 = vmax.f32 %v1065_v51, 0.0  ;;  %v1063_v20 = vadd.f32 %v939_v6, %v630_v22  ;;  %v676_v6 = vadd.f32 %v3046_v55, %v3156_v48 }
 0x1cc   : > { %v2429_v24 = vpack.c.bf16 %v1097_v18, %v1096_v11  ;;  %v1095_v57 = vmax.f32 %v1063_v20, 0.0  ;;  %v666_v20 = vadd.f32 %v3040_v42, %v3156_v48 }
 0x1ce   : > { %2501 = vst [vmem:[#allocation2 + $0x8] sm:$0xff] %v2429_v24   ;;  %v2424_v27 = vpack.c.bf16 %v1095_v57, %v1094_v21  ;;  %v680_v21 = vadd.f32 %v3052_v61, %v3156_v48 }
 0x1d0   : > { %2425 = vst [vmem:[#allocation2] sm:$0xff] %v2424_v27  }
 0x1d1   : > { %v2562_v10 = vpop.f32.mrf.mxu1 }
 0x1d2   : > { %v960_v28 = vadd.f32 %v2562_v10, %v3151_v41 }
 0x1d3   : > { %v951_v31 = vpop.f32.mrf.mxu1 }
 0x1d4   : > { %v952_v33 = vadd.f32 %v3151_v41, %v951_v31  ;;  %v1068_v39 = vadd.f32 %v960_v28, %v656_v63  ;;  %v670_v28 = vadd.f32 %v3044_v46, %v3156_v48 }
 0x1d5   : > { %v2563_v59 = vpop.f32.mrf.mxu1  ;;  %v2726_v22 = vld [vmem:[#allocation2 + $0x8] sm:$0xff]  }
 0x1d6   : > { %v963_v54 = vadd.f32 %v2563_v59, %v3151_v41  ;;  %v1066_v60 = vadd.f32 %v952_v33, %v646_v34  ;;  %v1100_v1 = vmax.f32 %v1068_v39, 0.0 }
 0x1d7   : > { %v954_v49 = vpop.f32.mrf.mxu1  ;;  %v2725_v53 = vld [vmem:[#allocation2] sm:$0xff]  }
 0x1d8   : > { %v1069_v62 = vadd.f32 %v963_v54, %v660_v37  ;;  %v955_v30 = vadd.f32 %v3151_v41, %v954_v49  ;;  %1661 = vmatmul.mubr.bf16.vlgmr.msra.gmra.mxu1 %v2725_v53  ;;  %1854 = vmatmul.mubr.bf16.vlgmr.msra.gmra.mxu0 %v2725_v53  ;;  %v1098_v36 = vmax.f32 %v1066_v60, 0.0 }
 0x1d9   : > { %1670 = vmatprep.mubr.bf16.mxu1 %v2765_v2  ;;  %1863 = vmatprep.mubr.bf16.mxu0 %v2765_v2 }
 0x1da   : > { %v1101_v8 = vmax.f32 %v1069_v62, 0.0  ;;  %v1067_v17 = vadd.f32 %v955_v30, %v650_v58  ;;  %v696_v58 = vadd.f32 %v3064_v19, %v3156_v48  ;;  %v686_v30 = vadd.f32 %v3056_v5, %v3156_v48 }
 0x1dc   : > { %v2439_v13 = vpack.c.bf16 %v1101_v8, %v1100_v1  ;;  %v1099_v15 = vmax.f32 %v1067_v17, 0.0  ;;  %v700_v1 = vadd.f32 %v3070_v25, %v3156_v48 }
 0x1de   : > { %2503 = vst [vmem:[#allocation2 + $0x18] sm:$0xff] %v2439_v13   ;;  %v2434_v52 = vpack.c.bf16 %v1099_v15, %v1098_v36  ;;  %v690_v15 = vadd.f32 %v3060_v12, %v3156_v48 }
 0x1e0   : > { %2502 = vst [vmem:[#allocation2 + $0x10] sm:$0xff] %v2434_v52   ;;  %1671 = vmatmul.mubr.bf16.gmra.mxu1 %v2726_v22  ;;  %1864 = vmatmul.mubr.bf16.gmra.mxu0 %v2726_v22 }
 0x1e1   : > { %v2566_v23 = vpop.f32.mrf.mxu1  ;;  %1680 = vmatprep.mubr.bf16.mxu1 %v2765_v2  ;;  %1873 = vmatprep.mubr.bf16.mxu0 %v2765_v2 }
 0x1e2   : > { %v976_v35 = vadd.f32 %v2566_v23, %v3151_v41 }
 0x1e3   : > { %v967_v51 = vpop.f32.mrf.mxu1 }
 0x1e4   : > { %v968_v11 = vadd.f32 %v3151_v41, %v967_v51  ;;  %v1072_v24 = vadd.f32 %v976_v35, %v676_v6 }
 0x1e5   : > { %v2567_v18 = vpop.f32.mrf.mxu1  ;;  %v2728_v54 = vld [vmem:[#allocation2 + $0x18] sm:$0xff]  }
 0x1e6   : > { %v979_v57 = vadd.f32 %v2567_v18, %v3151_v41  ;;  %v1070_v31 = vadd.f32 %v968_v11, %v666_v20  ;;  %v1104_v33 = vmax.f32 %v1072_v24, 0.0  ;;  %v716_v24 = vadd.f32 %v3082_v45, %v3156_v48 }
 0x1e7   : > { %v970_v27 = vpop.f32.mrf.mxu1  ;;  %v2727_v10 = vld [vmem:[#allocation2 + $0x10] sm:$0xff]  }
 0x1e8   : > { %v1073_v63 = vadd.f32 %v979_v57, %v680_v21  ;;  %v971_v55 = vadd.f32 %v3151_v41, %v970_v27  ;;  %1681 = vmatmul.mubr.bf16.gmra.mxu1 %v2727_v10  ;;  %1874 = vmatmul.mubr.bf16.gmra.mxu0 %v2727_v10  ;;  %v1102_v61 = vmax.f32 %v1070_v31, 0.0  ;;  %v706_v10 = vadd.f32 %v3074_v32, %v3156_v48 }
 0x1e9   : > { %1690 = vmatprep.mubr.bf16.mxu1 %v2765_v2  ;;  %1883 = vmatprep.mubr.bf16.mxu0 %v2765_v2 }
 0x1ea   : > { %v1105_v59 = vmax.f32 %v1073_v63, 0.0  ;;  %v1071_v42 = vadd.f32 %v971_v55, %v670_v28  ;;  %v720_v28 = vadd.f32 %v3086_v56, %v3156_v48 }
 0x1ec   : > { %v2449_v34 = vpack.c.bf16 %v1105_v59, %v1104_v33  ;;  %v1103_v37 = vmax.f32 %v1071_v42, 0.0  ;;  %v710_v59 = vadd.f32 %v3078_v38, %v3156_v48 }
 0x1ee   : > { %2505 = vst [vmem:[#allocation2 + $0x28] sm:$0xff] %v2449_v34   ;;  %v2444_v39 = vpack.c.bf16 %v1103_v37, %v1102_v61 }
 0x1f0   : > { %2504 = vst [vmem:[#allocation2 + $0x20] sm:$0xff] %v2444_v39   ;;  %1691 = vmatmul.mubr.bf16.gmra.mxu1 %v2728_v54  ;;  %1884 = vmatmul.mubr.bf16.gmra.mxu0 %v2728_v54 }
 0x1f1   : > { %v2570_v46 = vpop.f32.mrf.mxu1  ;;  %1700 = vmatprep.mubr.bf16.mxu1 %v2765_v2  ;;  %1893 = vmatprep.mubr.bf16.mxu0 %v2765_v2 }
 0x1f2   : > { %v992_v49 = vadd.f32 %v2570_v46, %v3151_v41 }
 0x1f3   : > { %v983_v53 = vpop.f32.mrf.mxu1 }
 0x1f4   : > { %v984_v60 = vadd.f32 %v3151_v41, %v983_v53  ;;  %v1076_v8 = vadd.f32 %v992_v49, %v696_v58  ;;  %v739_v58 = vpop.f32.mrf.mxu0 }
 0x1f5   : > { %v2571_v62 = vpop.f32.mrf.mxu1  ;;  %v2730_v18 = vld [vmem:[#allocation2 + $0x28] sm:$0xff]  }
 0x1f6   : > { %v995_v17 = vadd.f32 %v2571_v62, %v3151_v41  ;;  %v1074_v52 = vadd.f32 %v984_v60, %v686_v30  ;;  %v1108_v23 = vmax.f32 %v1076_v8, 0.0  ;;  %v736_v62 = vadd.f32 %v3113_v9, %v3156_v48 }
 0x1f7   : > { %v986_v36 = vpop.f32.mrf.mxu1  ;;  %v2729_v13 = vld [vmem:[#allocation2 + $0x20] sm:$0xff]   ;;  %v726_v8 = vadd.f32 %v3090_v4, %v3156_v48 }
 0x1f8   : > { %v1077_v22 = vadd.f32 %v995_v17, %v700_v1  ;;  %v987_v19 = vadd.f32 %v3151_v41, %v986_v36  ;;  %1701 = vmatmul.mubr.bf16.gmra.mxu1 %v2729_v13  ;;  %1894 = vmatmul.mubr.bf16.gmra.mxu0 %v2729_v13  ;;  %v1106_v25 = vmax.f32 %v1074_v52, 0.0  ;;  %v740_v17 = vadd.f32 %v739_v58, %v3156_v48 }
 0x1f9   : > { %1710 = vmatprep.mubr.bf16.mxu1 %v2765_v2  ;;  %1903 = vmatprep.mubr.bf16.mxu0 %v2765_v2 }
 0x1fa   : > { %v1109_v35 = vmax.f32 %v1077_v22, 0.0  ;;  %v1075_v5 = vadd.f32 %v987_v19, %v690_v15  ;;  %v730_v22 = vadd.f32 %v3094_v14, %v3156_v48 }
 0x1fc   : > { %v2459_v51 = vpack.c.bf16 %v1109_v35, %v1108_v23  ;;  %v1107_v6 = vmax.f32 %v1075_v5, 0.0 }
 0x1fe   : > { %2507 = vst [vmem:[#allocation2 + $0x38] sm:$0xff] %v2459_v51   ;;  %v2454_v11 = vpack.c.bf16 %v1107_v6, %v1106_v25  ;;  %v756_v6 = vadd.f32 %v3072_v29, %v3156_v48 }
 0x200   : > { %2506 = vst [vmem:[#allocation2 + $0x30] sm:$0xff] %v2454_v11   ;;  %1711 = vmatmul.mubr.bf16.gmra.mxu1 %v2730_v18  ;;  %1904 = vmatmul.mubr.bf16.gmra.mxu0 %v2730_v18 }
 0x201   : > { %v2574_v12 = vpop.f32.mrf.mxu1  ;;  %1720 = vmatprep.mubr.bf16.mxu1 %v2765_v2  ;;  %1913 = vmatprep.mubr.bf16.mxu0 %v2765_v2 }
 0x202   : > { %v1008_v20 = vadd.f32 %v2574_v12, %v3151_v41 }
 0x203   : > { %v999_v21 = vpop.f32.mrf.mxu1 }
 0x204   : > { %v1000_v57 = vadd.f32 %v3151_v41, %v999_v21  ;;  %v1080_v31 = vadd.f32 %v1008_v20, %v716_v24  ;;  %v746_v21 = vadd.f32 %v3054_v3, %v3156_v48 }
 0x205   : > { %v2575_v27 = vpop.f32.mrf.mxu1  ;;  %v2732_v49 = vld [vmem:[#allocation2 + $0x38] sm:$0xff]  }
 0x206   : > { %v1011_v63 = vadd.f32 %v2575_v27, %v3151_v41  ;;  %v1078_v42 = vadd.f32 %v1000_v57, %v706_v10  ;;  %v1112_v34 = vmax.f32 %v1080_v31, 0.0  ;;  %v760_v57 = vadd.f32 %v3080_v43, %v3156_v48 }
 0x207   : > { %v1002_v55 = vpop.f32.mrf.mxu1  ;;  %v2731_v33 = vld [vmem:[#allocation2 + $0x30] sm:$0xff]  }
 0x208   : > { %v1081_v61 = vadd.f32 %v1011_v63, %v720_v28  ;;  %v1003_v45 = vadd.f32 %v3151_v41, %v1002_v55  ;;  %1721 = vmatmul.mubr.bf16.gmra.mxu1 %v2731_v33  ;;  %1914 = vmatmul.mubr.bf16.gmra.mxu0 %v2731_v33  ;;  %v1110_v56 = vmax.f32 %v1078_v42, 0.0  ;;  %v750_v63 = vadd.f32 %v3062_v16, %v3156_v48 }
 0x209   : > { %1730 = vmatprep.mubr.bf16.mxu1 %v2765_v2  ;;  %1923 = vmatprep.mubr.bf16.mxu0 %v2765_v2  ;;  %v776_v16 = vadd.f32 %v3122_v7, %v3156_v48 }
 0x20a   : > { %v1113_v37 = vmax.f32 %v1081_v61, 0.0  ;;  %v1079_v32 = vadd.f32 %v1003_v45, %v710_v59 }
 0x20c   : > { %v2469_v39 = vpack.c.bf16 %v1113_v37, %v1112_v34  ;;  %v1111_v54 = vmax.f32 %v1079_v32, 0.0 }
 0x20e   : > { %2509 = vst [vmem:[#allocation2 + $0x48] sm:$0xff] %v2469_v39   ;;  %v2464_v46 = vpack.c.bf16 %v1111_v54, %v1110_v56  ;;  %v766_v54 = vadd.f32 %v3088_v0, %v3156_v48 }
 0x210   : > { %2508 = vst [vmem:[#allocation2 + $0x40] sm:$0xff] %v2464_v46   ;;  %1731 = vmatmul.mubr.bf16.gmra.mxu1 %v2732_v49  ;;  %1924 = vmatmul.mubr.bf16.gmra.mxu0 %v2732_v49  ;;  %v780_v49 = vadd.f32 %v3146_v44, %v3156_v48 }
 0x211   : > { %v2578_v38 = vpop.f32.mrf.mxu1  ;;  %1740 = vmatprep.mubr.bf16.mxu1 %v2765_v2  ;;  %1933 = vmatprep.mubr.bf16.mxu0 %v2765_v2 }
 0x212   : > { %v1024_v53 = vadd.f32 %v2578_v38, %v3151_v41 }
 0x213   : > { %v1015_v60 = vpop.f32.mrf.mxu1 }
 0x214   : > { %v1016_v30 = vadd.f32 %v3151_v41, %v1015_v60  ;;  %v1084_v36 = vadd.f32 %v1024_v53, %v736_v62  ;;  %v770_v62 = vadd.f32 %v3099_v26, %v3156_v48 }
 0x215   : > { %v2579_v1 = vpop.f32.mrf.mxu1  ;;  %v2734_v29 = vld [vmem:[#allocation2 + $0x48] sm:$0xff]  }
 0x216   : > { %v1027_v13 = vadd.f32 %v2579_v1, %v3151_v41  ;;  %v1082_v19 = vadd.f32 %v1016_v30, %v726_v8  ;;  %v1116_v5 = vmax.f32 %v1084_v36, 0.0 }
 0x217   : > { %v1018_v15 = vpop.f32.mrf.mxu1  ;;  %v2733_v52 = vld [vmem:[#allocation2 + $0x40] sm:$0xff]  }
 0x218   : > { %v1085_v23 = vadd.f32 %v1027_v13, %v740_v17  ;;  %v1019_v9 = vadd.f32 %v3151_v41, %v1018_v15  ;;  %1741 = vmatmul.mubr.bf16.gmra.mxu1 %v2733_v52  ;;  %1934 = vmatmul.mubr.bf16.gmra.mxu0 %v2733_v52  ;;  %v1114_v11 = vmax.f32 %v1082_v19, 0.0 }
 0x219   : > { %v2582_v35 = vpop.f32.mrf.mxu1  ;;  %1750 = vmatprep.mubr.bf16.mxu1 %v2765_v2  ;;  %1943 = vmatprep.mubr.bf16.mxu0 %v2765_v2 }
 0x21a   : > { %v1117_v25 = vmax.f32 %v1085_v23, 0.0  ;;  %v1083_v4 = vadd.f32 %v1019_v9, %v730_v22  ;;  %v1040_v51 = vadd.f32 %v2582_v35, %v3151_v41  ;;  %v1362_v23 = vsub.s32 2, %v2952_v47  ;;  %v1350_v9 = vld [vmem:[%s3577_s6] sm:$0xf] }
 0x21b   : > { %v1031_v14 = vpop.f32.mrf.mxu1  ;;  %v1366_v35 = vsub.s32 3, %v2952_v47 }
 0x21c   : > { %v2479_v18 = vpack.c.bf16 %v1117_v25, %v1116_v5  ;;  %v1115_v12 = vmax.f32 %v1083_v4, 0.0  ;;  %v1032_v20 = vadd.f32 %v3151_v41, %v1031_v14  ;;  %v1088_v10 = vadd.f32 %v1040_v51, %v756_v6 }
 0x21d   : > { %v2583_v24 = vpop.f32.mrf.mxu1  ;;  %v3291_v5 = vrot.slane %v1350_v9, %v405_v50  ;;  %v3293_v25 = vrot.slane %v1350_v9, %v1362_v23  ;;  %v3299_v4 = vrot.slane %v1350_v9, %v1366_v35 }
 0x21e   : > { %2511 = vst [vmem:[#allocation2 + $0x58] sm:$0xff] %v2479_v18   ;;  %v2474_v27 = vpack.c.bf16 %v1115_v12, %v1114_v11  ;;  %v1043_v28 = vadd.f32 %v2583_v24, %v3151_v41  ;;  %v1086_v55 = vadd.f32 %v1032_v20, %v746_v21  ;;  %v1120_v42 = vmax.f32 %v1088_v10, 0.0 }
 0x21f   : > { %v1034_v31 = vpop.f32.mrf.mxu1 }
 0x220   : > { %2510 = vst [vmem:[#allocation2 + $0x50] sm:$0xff] %v2474_v27   ;;  %v1089_v33 = vadd.f32 %v1043_v28, %v760_v57  ;;  %v1035_v59 = vadd.f32 %v3151_v41, %v1034_v31  ;;  %1751 = vmatmul.mubr.bf16.gmra.mxu1 %v2734_v29  ;;  %1944 = vmatmul.mubr.bf16.gmra.mxu0 %v2734_v29  ;;  %v1118_v37 = vmax.f32 %v1086_v55, 0.0 }
 0x221   : > { %v2586_v3 = vpop.f32.mrf.mxu1  ;;  %1760 = vmatprep.mubr.bf16.mxu1 %v2765_v2  ;;  %1953 = vmatprep.mubr.bf16.mxu0 %v2765_v2 }
 0x222   : > { %v1121_v43 = vmax.f32 %v1089_v33, 0.0  ;;  %v1087_v61 = vadd.f32 %v1035_v59, %v750_v63  ;;  %v1056_v45 = vadd.f32 %v2586_v3, %v3151_v41 }
 0x223   : > { %v1047_v34 = vpop.f32.mrf.mxu1 }
 0x224   : > { %v2489_v32 = vpack.c.bf16 %v1121_v43, %v1120_v42  ;;  %v1119_v56 = vmax.f32 %v1087_v61, 0.0  ;;  %v1048_v39 = vadd.f32 %v3151_v41, %v1047_v34  ;;  %v1092_v53 = vadd.f32 %v1056_v45, %v776_v16 }
 0x225   : > { %v2587_v46 = vpop.f32.mrf.mxu1  ;;  %v2736_v26 = vld [vmem:[#allocation2 + $0x58] sm:$0xff]  }
 0x226   : > { %2513 = vst [vmem:[#allocation2 + $0x68] sm:$0xff] %v2489_v32   ;;  %v2484_v38 = vpack.c.bf16 %v1119_v56, %v1118_v37  ;;  %v1059_v58 = vadd.f32 %v2587_v46, %v3151_v41  ;;  %v1090_v30 = vadd.f32 %v1048_v39, %v766_v54  ;;  %v1124_v0 = vmax.f32 %v1092_v53, 0.0 }
 0x227   : > { %v1050_v60 = vpop.f32.mrf.mxu1  ;;  %v2735_v7 = vld [vmem:[#allocation2 + $0x50] sm:$0xff]  }
 0x228   : > { %2512 = vst [vmem:[#allocation2 + $0x60] sm:$0xff] %v2484_v38   ;;  %v1093_v1 = vadd.f32 %v1059_v58, %v780_v49  ;;  %v1051_v8 = vadd.f32 %v3151_v41, %v1050_v60  ;;  %1761 = vmatmul.mubr.bf16.gmra.mxu1 %v2735_v7  ;;  %1954 = vmatmul.mubr.bf16.gmra.mxu0 %v2735_v7  ;;  %v1122_v36 = vmax.f32 %v1090_v30, 0.0 }
 0x229   : > { %1770 = vmatprep.mubr.bf16.mxu1 %v2765_v2  ;;  %1963 = vmatprep.mubr.bf16.mxu0 %v2765_v2 }
 0x22a   : > { %v1125_v17 = vmax.f32 %v1093_v1, 0.0  ;;  %v1091_v44 = vadd.f32 %v1051_v8, %v770_v62 }
 0x22c   : > { %v2499_v13 = vpack.c.bf16 %v1125_v17, %v1124_v0  ;;  %v1123_v15 = vmax.f32 %v1091_v44, 0.0 }
 0x22d   : > { %v2738_v48 = vld [vmem:[#allocation2 + $0x68] sm:$0xff]  }
 0x22e   : > { %2515 = vst [vmem:[#allocation2 + $0x78] sm:$0xff] %v2499_v13   ;;  %v2494_v52 = vpack.c.bf16 %v1123_v15, %v1122_v36 }
 0x22f   : > { %v2737_v41 = vld [vmem:[#allocation2 + $0x60] sm:$0xff]  }
 0x230   : > { %2514 = vst [vmem:[#allocation2 + $0x70] sm:$0xff] %v2494_v52   ;;  %1771 = vmatmul.mubr.bf16.gmra.mxu1 %v2736_v26  ;;  %1964 = vmatmul.mubr.bf16.gmra.mxu0 %v2736_v26 }
 0x231   : > { %1780 = vmatprep.mubr.bf16.mxu1 %v2765_v2  ;;  %1973 = vmatprep.mubr.bf16.mxu0 %v2765_v2 }
 0x235   : > { %v2740_v19 = vld [vmem:[#allocation2 + $0x78] sm:$0xff]  }
 0x237   : > { %v2739_v22 = vld [vmem:[#allocation2 + $0x70] sm:$0xff]  }
 0x238   : > { %1781 = vmatmul.mubr.bf16.gmra.mxu1 %v2737_v41  ;;  %1974 = vmatmul.mubr.bf16.gmra.mxu0 %v2737_v41 }
 0x239   : > { %1790 = vmatprep.mubr.bf16.mxu1 %v2765_v2  ;;  %1983 = vmatprep.mubr.bf16.mxu0 %v2765_v2 }
 0x240   : > { %1791 = vmatmul.mubr.bf16.gmra.mxu1 %v2738_v48  ;;  %1984 = vmatmul.mubr.bf16.gmra.mxu0 %v2738_v48 }
 0x241   : > { %1800 = vmatprep.mubr.bf16.mxu1 %v2765_v2  ;;  %1993 = vmatprep.mubr.bf16.mxu0 %v2765_v2 }
 0x248   : > { %1801 = vmatmul.mubr.bf16.gmra.mxu1 %v2739_v22  ;;  %1994 = vmatmul.mubr.bf16.gmra.mxu0 %v2739_v22 }
 0x249   : > { %1810 = vmatprep.mubr.bf16.mxu1 %v2765_v2  ;;  %2003 = vmatprep.mubr.bf16.mxu0 %v2765_v2  ;;  %v3297_v2 = vrot.slane %v1350_v9, %v409_v40 }
 0x250   : > { %1811 = vmatmul.mubr.bf16.gmra.mxu1 %v2740_v19  ;;  %2004 = vmatmul.mubr.bf16.gmra.mxu0 %v2740_v19 }
 0x298   : > { %v1662_v51 = vpop.f32.mrf.mxu1  ;;  %v1855_v50 = vpop.f32.mrf.mxu0 }
 0x299   : > { %v1663_v6 = vadd.f32 %v1662_v51, %v3291_v5  ;;  %v1856_v47 = vadd.f32 %v1855_v50, %v3293_v25 }
 0x29a   : > { %v1664_v40 = vpop.f32.mrf.mxu1  ;;  %v1857_v14 = vpop.f32.mrf.mxu0 }
 0x29b   : > { %2014 = vst [vmem:[%s3304_s18] sm:$0xff] %v1663_v6  ;;  %2016 = vst [vmem:[%s3304_s18 + $0x10] sm:$0xff] %v1856_v47  ;;  %v1665_v11 = vadd.f32 %v1664_v40, %v3297_v2  ;;  %v1858_v18 = vadd.f32 %v1857_v14, %v3299_v4 }
 0x29c   : > { %v1666_v12 = vpop.f32.mrf.mxu1  ;;  %v1859_v20 = vpop.f32.mrf.mxu0 }
 0x29d   : > { %2015 = vst [vmem:[%s3304_s18 + $0x8] sm:$0xff] %v1665_v11  ;;  %2017 = vst [vmem:[%s3304_s18 + $0x18] sm:$0xff] %v1858_v18  ;;  %v1667_v21 = vadd.f32 %v1666_v12, %v3291_v5  ;;  %v1860_v24 = vadd.f32 %v1859_v20, %v3293_v25 }
 0x29e   : > { %v1668_v57 = vpop.f32.mrf.mxu1  ;;  %v1861_v27 = vpop.f32.mrf.mxu0 }
 0x29f   : > { %2018 = vst [vmem:[%s3304_s18 + $0x20] sm:$0xff] %v1667_v21  ;;  %2020 = vst [vmem:[%s3304_s18 + $0x30] sm:$0xff] %v1860_v24  ;;  %v1669_v10 = vadd.f32 %v1668_v57, %v3297_v2  ;;  %v1862_v28 = vadd.f32 %v1861_v27, %v3299_v4 }
 0x2a0   : > { %v1672_v31 = vpop.f32.mrf.mxu1  ;;  %v1865_v29 = vpop.f32.mrf.mxu0 }
 0x2a1   : > { %2019 = vst [vmem:[%s3304_s18 + $0x28] sm:$0xff] %v1669_v10  ;;  %2021 = vst [vmem:[%s3304_s18 + $0x38] sm:$0xff] %v1862_v28  ;;  %v1673_v63 = vadd.f32 %v1672_v31, %v3291_v5  ;;  %v1866_v55 = vadd.f32 %v1865_v29, %v3293_v25 }
 0x2a2   : > { %v1674_v33 = vpop.f32.mrf.mxu1  ;;  %v1867_v59 = vpop.f32.mrf.mxu0 }
 0x2a3   : > { %2022 = vst [vmem:[%s3304_s18 + $0x40] sm:$0xff] %v1673_v63  ;;  %2024 = vst [vmem:[%s3304_s18 + $0x50] sm:$0xff] %v1866_v55  ;;  %v1675_v3 = vadd.f32 %v1674_v33, %v3297_v2  ;;  %v1868_v42 = vadd.f32 %v1867_v59, %v3299_v4 }
 0x2a4   : > { %v1676_v43 = vpop.f32.mrf.mxu1  ;;  %v1869_v61 = vpop.f32.mrf.mxu0 }
 0x2a5   : > { %2023 = vst [vmem:[%s3304_s18 + $0x48] sm:$0xff] %v1675_v3  ;;  %2025 = vst [vmem:[%s3304_s18 + $0x58] sm:$0xff] %v1868_v42  ;;  %v1677_v45 = vadd.f32 %v1676_v43, %v3291_v5  ;;  %v1870_v16 = vadd.f32 %v1869_v61, %v3293_v25 }
 0x2a6   : > { %v1678_v34 = vpop.f32.mrf.mxu1  ;;  %v1871_v37 = vpop.f32.mrf.mxu0 }
 0x2a7   : > { %2026 = vst [vmem:[%s3304_s18 + $0x60] sm:$0xff] %v1677_v45  ;;  %2028 = vst [vmem:[%s3304_s18 + $0x70] sm:$0xff] %v1870_v16  ;;  %v1679_v32 = vadd.f32 %v1678_v34, %v3297_v2  ;;  %v1872_v56 = vadd.f32 %v1871_v37, %v3299_v4 }
 0x2a8   : > { %v1682_v39 = vpop.f32.mrf.mxu1  ;;  %v1875_v54 = vpop.f32.mrf.mxu0 }
 0x2a9   : > { %2027 = vst [vmem:[%s3304_s18 + $0x68] sm:$0xff] %v1679_v32  ;;  %2029 = vst [vmem:[%s3304_s18 + $0x78] sm:$0xff] %v1872_v56  ;;  %v1683_v46 = vadd.f32 %v1682_v39, %v3291_v5  ;;  %v1876_v49 = vadd.f32 %v1875_v54, %v3293_v25 }
 0x2aa   : > { %v1684_v38 = vpop.f32.mrf.mxu1  ;;  %v1877_v53 = vpop.f32.mrf.mxu0 }
 0x2ab   : > { %2030 = vst [vmem:[%s3304_s18 + $0x80] sm:$0xff] %v1683_v46  ;;  %2032 = vst [vmem:[%s3304_s18 + $0x90] sm:$0xff] %v1876_v49  ;;  %v1685_v58 = vadd.f32 %v1684_v38, %v3297_v2  ;;  %v1878_v60 = vadd.f32 %v1877_v53, %v3299_v4 }
 0x2ac   : > { %v1686_v7 = vpop.f32.mrf.mxu1  ;;  %v1879_v62 = vpop.f32.mrf.mxu0 }
 0x2ad   : > { %2031 = vst [vmem:[%s3304_s18 + $0x88] sm:$0xff] %v1685_v58  ;;  %2033 = vst [vmem:[%s3304_s18 + $0x98] sm:$0xff] %v1878_v60  ;;  %v1687_v30 = vadd.f32 %v1686_v7, %v3291_v5  ;;  %v1880_v1 = vadd.f32 %v1879_v62, %v3293_v25 }
 0x2ae   : > { %v1688_v8 = vpop.f32.mrf.mxu1  ;;  %v1881_v0 = vpop.f32.mrf.mxu0 }
 0x2af   : > { %2034 = vst [vmem:[%s3304_s18 + $0xa0] sm:$0xff] %v1687_v30  ;;  %2036 = vst [vmem:[%s3304_s18 + $0xb0] sm:$0xff] %v1880_v1  ;;  %v1689_v17 = vadd.f32 %v1688_v8, %v3297_v2  ;;  %v1882_v44 = vadd.f32 %v1881_v0, %v3299_v4 }
 0x2b0   : > { %v1692_v36 = vpop.f32.mrf.mxu1  ;;  %v1885_v13 = vpop.f32.mrf.mxu0 }
 0x2b1   : > { %2035 = vst [vmem:[%s3304_s18 + $0xa8] sm:$0xff] %v1689_v17  ;;  %2037 = vst [vmem:[%s3304_s18 + $0xb8] sm:$0xff] %v1882_v44  ;;  %v1693_v15 = vadd.f32 %v1692_v36, %v3291_v5  ;;  %v1886_v52 = vadd.f32 %v1885_v13, %v3293_v25 }
 0x2b2   : > { %v1694_v26 = vpop.f32.mrf.mxu1  ;;  %v1887_v41 = vpop.f32.mrf.mxu0 }
 0x2b3   : > { %2038 = vst [vmem:[%s3304_s18 + $0xc0] sm:$0xff] %v1693_v15  ;;  %2040 = vst [vmem:[%s3304_s18 + $0xd0] sm:$0xff] %v1886_v52  ;;  %v1695_v48 = vadd.f32 %v1694_v26, %v3297_v2  ;;  %v1888_v22 = vadd.f32 %v1887_v41, %v3299_v4 }
 0x2b4   : > { %v1696_v19 = vpop.f32.mrf.mxu1  ;;  %v1889_v23 = vpop.f32.mrf.mxu0 }
 0x2b5   : > { %2039 = vst [vmem:[%s3304_s18 + $0xc8] sm:$0xff] %v1695_v48  ;;  %2041 = vst [vmem:[%s3304_s18 + $0xd8] sm:$0xff] %v1888_v22  ;;  %v1697_v9 = vadd.f32 %v1696_v19, %v3291_v5  ;;  %v1890_v35 = vadd.f32 %v1889_v23, %v3293_v25 }
 0x2b6   : > { %v1698_v51 = vpop.f32.mrf.mxu1  ;;  %v1891_v50 = vpop.f32.mrf.mxu0 }
 0x2b7   : > { %2042 = vst [vmem:[%s3304_s18 + $0xe0] sm:$0xff] %v1697_v9  ;;  %2044 = vst [vmem:[%s3304_s18 + $0xf0] sm:$0xff] %v1890_v35  ;;  %v1699_v6 = vadd.f32 %v1698_v51, %v3297_v2  ;;  %v1892_v47 = vadd.f32 %v1891_v50, %v3299_v4 }
 0x2b8   : > { %v1702_v40 = vpop.f32.mrf.mxu1  ;;  %v1895_v14 = vpop.f32.mrf.mxu0 }
 0x2b9   : > { %2043 = vst [vmem:[%s3304_s18 + $0xe8] sm:$0xff] %v1699_v6  ;;  %2045 = vst [vmem:[%s3304_s18 + $0xf8] sm:$0xff] %v1892_v47  ;;  %v1703_v11 = vadd.f32 %v1702_v40, %v3291_v5  ;;  %v1896_v18 = vadd.f32 %v1895_v14, %v3293_v25 }
 0x2ba   : > { %v1704_v12 = vpop.f32.mrf.mxu1  ;;  %v1897_v20 = vpop.f32.mrf.mxu0 }
 0x2bb   : > { %2046 = vst [vmem:[%s3304_s18 + $0x100] sm:$0xff] %v1703_v11  ;;  %2048 = vst [vmem:[%s3304_s18 + $0x110] sm:$0xff] %v1896_v18  ;;  %v1705_v21 = vadd.f32 %v1704_v12, %v3297_v2  ;;  %v1898_v24 = vadd.f32 %v1897_v20, %v3299_v4 }
 0x2bc   : > { %v1706_v57 = vpop.f32.mrf.mxu1  ;;  %v1899_v27 = vpop.f32.mrf.mxu0 }
 0x2bd   : > { %2047 = vst [vmem:[%s3304_s18 + $0x108] sm:$0xff] %v1705_v21  ;;  %2049 = vst [vmem:[%s3304_s18 + $0x118] sm:$0xff] %v1898_v24  ;;  %v1707_v10 = vadd.f32 %v1706_v57, %v3291_v5  ;;  %v1900_v28 = vadd.f32 %v1899_v27, %v3293_v25 }
 0x2be   : > { %v1708_v31 = vpop.f32.mrf.mxu1  ;;  %v1901_v29 = vpop.f32.mrf.mxu0 }
 0x2bf   : > { %2050 = vst [vmem:[%s3304_s18 + $0x120] sm:$0xff] %v1707_v10  ;;  %2052 = vst [vmem:[%s3304_s18 + $0x130] sm:$0xff] %v1900_v28  ;;  %v1709_v63 = vadd.f32 %v1708_v31, %v3297_v2  ;;  %v1902_v55 = vadd.f32 %v1901_v29, %v3299_v4 }
 0x2c0   : > { %v1712_v33 = vpop.f32.mrf.mxu1  ;;  %v1905_v59 = vpop.f32.mrf.mxu0 }
 0x2c1   : > { %2051 = vst [vmem:[%s3304_s18 + $0x128] sm:$0xff] %v1709_v63  ;;  %2053 = vst [vmem:[%s3304_s18 + $0x138] sm:$0xff] %v1902_v55  ;;  %v1713_v3 = vadd.f32 %v1712_v33, %v3291_v5  ;;  %v1906_v42 = vadd.f32 %v1905_v59, %v3293_v25 }
 0x2c2   : > { %v1714_v43 = vpop.f32.mrf.mxu1  ;;  %v1907_v61 = vpop.f32.mrf.mxu0 }
 0x2c3   : > { %2054 = vst [vmem:[%s3304_s18 + $0x140] sm:$0xff] %v1713_v3  ;;  %2056 = vst [vmem:[%s3304_s18 + $0x150] sm:$0xff] %v1906_v42  ;;  %v1715_v45 = vadd.f32 %v1714_v43, %v3297_v2  ;;  %v1908_v16 = vadd.f32 %v1907_v61, %v3299_v4 }
 0x2c4   : > { %v1716_v34 = vpop.f32.mrf.mxu1  ;;  %v1909_v37 = vpop.f32.mrf.mxu0 }
 0x2c5   : > { %2055 = vst [vmem:[%s3304_s18 + $0x148] sm:$0xff] %v1715_v45  ;;  %2057 = vst [vmem:[%s3304_s18 + $0x158] sm:$0xff] %v1908_v16  ;;  %v1717_v32 = vadd.f32 %v1716_v34, %v3291_v5  ;;  %v1910_v56 = vadd.f32 %v1909_v37, %v3293_v25 }
 0x2c6   : > { %v1718_v39 = vpop.f32.mrf.mxu1  ;;  %v1911_v54 = vpop.f32.mrf.mxu0 }
 0x2c7   : > { %2058 = vst [vmem:[%s3304_s18 + $0x160] sm:$0xff] %v1717_v32  ;;  %2060 = vst [vmem:[%s3304_s18 + $0x170] sm:$0xff] %v1910_v56  ;;  %v1719_v46 = vadd.f32 %v1718_v39, %v3297_v2  ;;  %v1912_v49 = vadd.f32 %v1911_v54, %v3299_v4 }
 0x2c8   : > { %v1722_v38 = vpop.f32.mrf.mxu1  ;;  %v1915_v53 = vpop.f32.mrf.mxu0 }
 0x2c9   : > { %2059 = vst [vmem:[%s3304_s18 + $0x168] sm:$0xff] %v1719_v46  ;;  %2061 = vst [vmem:[%s3304_s18 + $0x178] sm:$0xff] %v1912_v49  ;;  %v1723_v58 = vadd.f32 %v1722_v38, %v3291_v5  ;;  %v1916_v60 = vadd.f32 %v1915_v53, %v3293_v25 }
 0x2ca   : > { %v1724_v7 = vpop.f32.mrf.mxu1  ;;  %v1917_v62 = vpop.f32.mrf.mxu0 }
 0x2cb   : > { %2062 = vst [vmem:[%s3304_s18 + $0x180] sm:$0xff] %v1723_v58  ;;  %2064 = vst [vmem:[%s3304_s18 + $0x190] sm:$0xff] %v1916_v60  ;;  %v1725_v30 = vadd.f32 %v1724_v7, %v3297_v2  ;;  %v1918_v1 = vadd.f32 %v1917_v62, %v3299_v4 }
 0x2cc   : > { %v1726_v8 = vpop.f32.mrf.mxu1  ;;  %v1919_v0 = vpop.f32.mrf.mxu0 }
 0x2cd   : > { %2063 = vst [vmem:[%s3304_s18 + $0x188] sm:$0xff] %v1725_v30  ;;  %2065 = vst [vmem:[%s3304_s18 + $0x198] sm:$0xff] %v1918_v1  ;;  %v1727_v17 = vadd.f32 %v1726_v8, %v3291_v5  ;;  %v1920_v44 = vadd.f32 %v1919_v0, %v3293_v25 }
 0x2ce   : > { %v1728_v36 = vpop.f32.mrf.mxu1  ;;  %v1921_v13 = vpop.f32.mrf.mxu0 }
 0x2cf   : > { %2066 = vst [vmem:[%s3304_s18 + $0x1a0] sm:$0xff] %v1727_v17  ;;  %2068 = vst [vmem:[%s3304_s18 + $0x1b0] sm:$0xff] %v1920_v44  ;;  %v1729_v15 = vadd.f32 %v1728_v36, %v3297_v2  ;;  %v1922_v52 = vadd.f32 %v1921_v13, %v3299_v4 }
 0x2d0   : > { %v1732_v26 = vpop.f32.mrf.mxu1  ;;  %v1925_v41 = vpop.f32.mrf.mxu0 }
 0x2d1   : > { %2067 = vst [vmem:[%s3304_s18 + $0x1a8] sm:$0xff] %v1729_v15  ;;  %2069 = vst [vmem:[%s3304_s18 + $0x1b8] sm:$0xff] %v1922_v52  ;;  %v1733_v48 = vadd.f32 %v1732_v26, %v3291_v5  ;;  %v1926_v22 = vadd.f32 %v1925_v41, %v3293_v25 }
 0x2d2   : > { %v1734_v19 = vpop.f32.mrf.mxu1  ;;  %v1927_v23 = vpop.f32.mrf.mxu0 }
 0x2d3   : > { %2070 = vst [vmem:[%s3304_s18 + $0x1c0] sm:$0xff] %v1733_v48  ;;  %2072 = vst [vmem:[%s3304_s18 + $0x1d0] sm:$0xff] %v1926_v22  ;;  %v1735_v9 = vadd.f32 %v1734_v19, %v3297_v2  ;;  %v1928_v35 = vadd.f32 %v1927_v23, %v3299_v4 }
 0x2d4   : > { %v1736_v51 = vpop.f32.mrf.mxu1  ;;  %v1929_v50 = vpop.f32.mrf.mxu0 }
 0x2d5   : > { %2071 = vst [vmem:[%s3304_s18 + $0x1c8] sm:$0xff] %v1735_v9  ;;  %2073 = vst [vmem:[%s3304_s18 + $0x1d8] sm:$0xff] %v1928_v35  ;;  %v1737_v6 = vadd.f32 %v1736_v51, %v3291_v5  ;;  %v1930_v47 = vadd.f32 %v1929_v50, %v3293_v25 }
 0x2d6   : > { %v1738_v40 = vpop.f32.mrf.mxu1  ;;  %v1931_v14 = vpop.f32.mrf.mxu0 }
 0x2d7   : > { %2074 = vst [vmem:[%s3304_s18 + $0x1e0] sm:$0xff] %v1737_v6  ;;  %2076 = vst [vmem:[%s3304_s18 + $0x1f0] sm:$0xff] %v1930_v47  ;;  %v1739_v11 = vadd.f32 %v1738_v40, %v3297_v2  ;;  %v1932_v18 = vadd.f32 %v1931_v14, %v3299_v4 }
 0x2d8   : > { %v1742_v12 = vpop.f32.mrf.mxu1  ;;  %v1935_v20 = vpop.f32.mrf.mxu0 }
 0x2d9   : > { %2075 = vst [vmem:[%s3304_s18 + $0x1e8] sm:$0xff] %v1739_v11  ;;  %2077 = vst [vmem:[%s3304_s18 + $0x1f8] sm:$0xff] %v1932_v18  ;;  %v1743_v21 = vadd.f32 %v1742_v12, %v3291_v5  ;;  %v1936_v24 = vadd.f32 %v1935_v20, %v3293_v25 }
 0x2da   : > { %v1744_v57 = vpop.f32.mrf.mxu1  ;;  %v1937_v27 = vpop.f32.mrf.mxu0 }
 0x2db   : > { %2078 = vst [vmem:[%s3304_s18 + $0x200] sm:$0xff] %v1743_v21  ;;  %2080 = vst [vmem:[%s3304_s18 + $0x210] sm:$0xff] %v1936_v24  ;;  %v1745_v10 = vadd.f32 %v1744_v57, %v3297_v2  ;;  %v1938_v28 = vadd.f32 %v1937_v27, %v3299_v4 }
 0x2dc   : > { %v1746_v31 = vpop.f32.mrf.mxu1  ;;  %v1939_v29 = vpop.f32.mrf.mxu0 }
 0x2dd   : > { %2079 = vst [vmem:[%s3304_s18 + $0x208] sm:$0xff] %v1745_v10  ;;  %2081 = vst [vmem:[%s3304_s18 + $0x218] sm:$0xff] %v1938_v28  ;;  %v1747_v63 = vadd.f32 %v1746_v31, %v3291_v5  ;;  %v1940_v55 = vadd.f32 %v1939_v29, %v3293_v25 }
 0x2de   : > { %v1748_v33 = vpop.f32.mrf.mxu1  ;;  %v1941_v59 = vpop.f32.mrf.mxu0 }
 0x2df   : > { %2082 = vst [vmem:[%s3304_s18 + $0x220] sm:$0xff] %v1747_v63  ;;  %2084 = vst [vmem:[%s3304_s18 + $0x230] sm:$0xff] %v1940_v55  ;;  %v1749_v3 = vadd.f32 %v1748_v33, %v3297_v2  ;;  %v1942_v42 = vadd.f32 %v1941_v59, %v3299_v4 }
 0x2e0   : > { %v1752_v43 = vpop.f32.mrf.mxu1  ;;  %v1945_v61 = vpop.f32.mrf.mxu0 }
 0x2e1   : > { %2083 = vst [vmem:[%s3304_s18 + $0x228] sm:$0xff] %v1749_v3  ;;  %2085 = vst [vmem:[%s3304_s18 + $0x238] sm:$0xff] %v1942_v42  ;;  %v1753_v45 = vadd.f32 %v1752_v43, %v3291_v5  ;;  %v1946_v16 = vadd.f32 %v1945_v61, %v3293_v25 }
 0x2e2   : > { %v1754_v34 = vpop.f32.mrf.mxu1  ;;  %v1947_v37 = vpop.f32.mrf.mxu0 }
 0x2e3   : > { %2086 = vst [vmem:[%s3304_s18 + $0x240] sm:$0xff] %v1753_v45  ;;  %2088 = vst [vmem:[%s3304_s18 + $0x250] sm:$0xff] %v1946_v16  ;;  %v1755_v32 = vadd.f32 %v1754_v34, %v3297_v2  ;;  %v1948_v56 = vadd.f32 %v1947_v37, %v3299_v4 }
 0x2e4   : > { %v1756_v39 = vpop.f32.mrf.mxu1  ;;  %v1949_v54 = vpop.f32.mrf.mxu0 }
 0x2e5   : > { %2087 = vst [vmem:[%s3304_s18 + $0x248] sm:$0xff] %v1755_v32  ;;  %2089 = vst [vmem:[%s3304_s18 + $0x258] sm:$0xff] %v1948_v56  ;;  %v1757_v46 = vadd.f32 %v1756_v39, %v3291_v5  ;;  %v1950_v49 = vadd.f32 %v1949_v54, %v3293_v25 }
 0x2e6   : > { %v1758_v38 = vpop.f32.mrf.mxu1  ;;  %v1951_v53 = vpop.f32.mrf.mxu0 }
 0x2e7   : > { %2090 = vst [vmem:[%s3304_s18 + $0x260] sm:$0xff] %v1757_v46  ;;  %2092 = vst [vmem:[%s3304_s18 + $0x270] sm:$0xff] %v1950_v49  ;;  %v1759_v58 = vadd.f32 %v1758_v38, %v3297_v2  ;;  %v1952_v60 = vadd.f32 %v1951_v53, %v3299_v4 }
 0x2e8   : > { %v1762_v7 = vpop.f32.mrf.mxu1  ;;  %v1955_v62 = vpop.f32.mrf.mxu0 }
 0x2e9   : > { %2091 = vst [vmem:[%s3304_s18 + $0x268] sm:$0xff] %v1759_v58  ;;  %2093 = vst [vmem:[%s3304_s18 + $0x278] sm:$0xff] %v1952_v60  ;;  %v1763_v30 = vadd.f32 %v1762_v7, %v3291_v5  ;;  %v1956_v1 = vadd.f32 %v1955_v62, %v3293_v25 }
 0x2ea   : > { %v1764_v8 = vpop.f32.mrf.mxu1  ;;  %v1957_v0 = vpop.f32.mrf.mxu0 }
 0x2eb   : > { %2094 = vst [vmem:[%s3304_s18 + $0x280] sm:$0xff] %v1763_v30  ;;  %2096 = vst [vmem:[%s3304_s18 + $0x290] sm:$0xff] %v1956_v1  ;;  %v1765_v17 = vadd.f32 %v1764_v8, %v3297_v2  ;;  %v1958_v44 = vadd.f32 %v1957_v0, %v3299_v4 }
 0x2ec   : > { %v1766_v36 = vpop.f32.mrf.mxu1  ;;  %v1959_v13 = vpop.f32.mrf.mxu0 }
 0x2ed   : > { %2095 = vst [vmem:[%s3304_s18 + $0x288] sm:$0xff] %v1765_v17  ;;  %2097 = vst [vmem:[%s3304_s18 + $0x298] sm:$0xff] %v1958_v44  ;;  %v1767_v15 = vadd.f32 %v1766_v36, %v3291_v5  ;;  %v1960_v52 = vadd.f32 %v1959_v13, %v3293_v25 }
 0x2ee   : > { %v1768_v26 = vpop.f32.mrf.mxu1  ;;  %v1961_v41 = vpop.f32.mrf.mxu0 }
 0x2ef   : > { %2098 = vst [vmem:[%s3304_s18 + $0x2a0] sm:$0xff] %v1767_v15  ;;  %2100 = vst [vmem:[%s3304_s18 + $0x2b0] sm:$0xff] %v1960_v52  ;;  %v1769_v48 = vadd.f32 %v1768_v26, %v3297_v2  ;;  %v1962_v22 = vadd.f32 %v1961_v41, %v3299_v4 }
 0x2f0   : > { %v1772_v19 = vpop.f32.mrf.mxu1  ;;  %v1965_v23 = vpop.f32.mrf.mxu0 }
 0x2f1   : > { %2099 = vst [vmem:[%s3304_s18 + $0x2a8] sm:$0xff] %v1769_v48  ;;  %2101 = vst [vmem:[%s3304_s18 + $0x2b8] sm:$0xff] %v1962_v22  ;;  %v1773_v9 = vadd.f32 %v1772_v19, %v3291_v5  ;;  %v1966_v35 = vadd.f32 %v1965_v23, %v3293_v25 }
 0x2f2   : > { %v1774_v51 = vpop.f32.mrf.mxu1  ;;  %v1967_v50 = vpop.f32.mrf.mxu0 }
 0x2f3   : > { %2102 = vst [vmem:[%s3304_s18 + $0x2c0] sm:$0xff] %v1773_v9  ;;  %2104 = vst [vmem:[%s3304_s18 + $0x2d0] sm:$0xff] %v1966_v35  ;;  %v1775_v6 = vadd.f32 %v1774_v51, %v3297_v2  ;;  %v1968_v47 = vadd.f32 %v1967_v50, %v3299_v4 }
 0x2f4   : > { %v1776_v40 = vpop.f32.mrf.mxu1  ;;  %v1969_v14 = vpop.f32.mrf.mxu0 }
 0x2f5   : > { %2103 = vst [vmem:[%s3304_s18 + $0x2c8] sm:$0xff] %v1775_v6  ;;  %2105 = vst [vmem:[%s3304_s18 + $0x2d8] sm:$0xff] %v1968_v47  ;;  %v1777_v11 = vadd.f32 %v1776_v40, %v3291_v5  ;;  %v1970_v18 = vadd.f32 %v1969_v14, %v3293_v25 }
 0x2f6   : > { %v1778_v12 = vpop.f32.mrf.mxu1  ;;  %v1971_v20 = vpop.f32.mrf.mxu0 }
 0x2f7   : > { %2106 = vst [vmem:[%s3304_s18 + $0x2e0] sm:$0xff] %v1777_v11  ;;  %2108 = vst [vmem:[%s3304_s18 + $0x2f0] sm:$0xff] %v1970_v18  ;;  %v1779_v21 = vadd.f32 %v1778_v12, %v3297_v2  ;;  %v1972_v24 = vadd.f32 %v1971_v20, %v3299_v4 }
 0x2f8   : > { %v1782_v57 = vpop.f32.mrf.mxu1  ;;  %v1975_v27 = vpop.f32.mrf.mxu0 }
 0x2f9   : > { %2107 = vst [vmem:[%s3304_s18 + $0x2e8] sm:$0xff] %v1779_v21  ;;  %2109 = vst [vmem:[%s3304_s18 + $0x2f8] sm:$0xff] %v1972_v24  ;;  %v1783_v10 = vadd.f32 %v1782_v57, %v3291_v5  ;;  %v1976_v28 = vadd.f32 %v1975_v27, %v3293_v25 }
 0x2fa   : > { %v1784_v31 = vpop.f32.mrf.mxu1  ;;  %v1977_v29 = vpop.f32.mrf.mxu0 }
 0x2fb   : > { %2110 = vst [vmem:[%s3304_s18 + $0x300] sm:$0xff] %v1783_v10  ;;  %2112 = vst [vmem:[%s3304_s18 + $0x310] sm:$0xff] %v1976_v28  ;;  %v1785_v63 = vadd.f32 %v1784_v31, %v3297_v2  ;;  %v1978_v55 = vadd.f32 %v1977_v29, %v3299_v4 }
 0x2fc   : > { %v1786_v33 = vpop.f32.mrf.mxu1  ;;  %v1979_v59 = vpop.f32.mrf.mxu0 }
 0x2fd   : > { %2111 = vst [vmem:[%s3304_s18 + $0x308] sm:$0xff] %v1785_v63  ;;  %2113 = vst [vmem:[%s3304_s18 + $0x318] sm:$0xff] %v1978_v55  ;;  %v1787_v3 = vadd.f32 %v1786_v33, %v3291_v5  ;;  %v1980_v42 = vadd.f32 %v1979_v59, %v3293_v25 }
 0x2fe   : > { %v1788_v43 = vpop.f32.mrf.mxu1  ;;  %v1981_v61 = vpop.f32.mrf.mxu0 }
 0x2ff   : > { %2114 = vst [vmem:[%s3304_s18 + $0x320] sm:$0xff] %v1787_v3  ;;  %2116 = vst [vmem:[%s3304_s18 + $0x330] sm:$0xff] %v1980_v42  ;;  %v1789_v45 = vadd.f32 %v1788_v43, %v3297_v2  ;;  %v1982_v16 = vadd.f32 %v1981_v61, %v3299_v4 }
 0x300   : > { %v1792_v34 = vpop.f32.mrf.mxu1  ;;  %v1985_v37 = vpop.f32.mrf.mxu0 }
 0x301   : > { %2115 = vst [vmem:[%s3304_s18 + $0x328] sm:$0xff] %v1789_v45  ;;  %2117 = vst [vmem:[%s3304_s18 + $0x338] sm:$0xff] %v1982_v16  ;;  %v1793_v32 = vadd.f32 %v1792_v34, %v3291_v5  ;;  %v1986_v56 = vadd.f32 %v1985_v37, %v3293_v25 }
 0x302   : > { %v1794_v39 = vpop.f32.mrf.mxu1  ;;  %v1987_v54 = vpop.f32.mrf.mxu0 }
 0x303   : > { %2118 = vst [vmem:[%s3304_s18 + $0x340] sm:$0xff] %v1793_v32  ;;  %2120 = vst [vmem:[%s3304_s18 + $0x350] sm:$0xff] %v1986_v56  ;;  %v1795_v46 = vadd.f32 %v1794_v39, %v3297_v2  ;;  %v1988_v49 = vadd.f32 %v1987_v54, %v3299_v4 }
 0x304   : > { %v1796_v38 = vpop.f32.mrf.mxu1  ;;  %v1989_v53 = vpop.f32.mrf.mxu0 }
 0x305   : > { %2119 = vst [vmem:[%s3304_s18 + $0x348] sm:$0xff] %v1795_v46  ;;  %2121 = vst [vmem:[%s3304_s18 + $0x358] sm:$0xff] %v1988_v49  ;;  %v1797_v58 = vadd.f32 %v1796_v38, %v3291_v5  ;;  %v1990_v60 = vadd.f32 %v1989_v53, %v3293_v25 }
 0x306   : > { %v1798_v7 = vpop.f32.mrf.mxu1  ;;  %v1991_v62 = vpop.f32.mrf.mxu0 }
 0x307   : > { %2122 = vst [vmem:[%s3304_s18 + $0x360] sm:$0xff] %v1797_v58  ;;  %2124 = vst [vmem:[%s3304_s18 + $0x370] sm:$0xff] %v1990_v60  ;;  %v1799_v30 = vadd.f32 %v1798_v7, %v3297_v2  ;;  %v1992_v1 = vadd.f32 %v1991_v62, %v3299_v4 }
 0x308   : > { %v1802_v8 = vpop.f32.mrf.mxu1  ;;  %v1995_v0 = vpop.f32.mrf.mxu0 }
 0x309   : > { %2123 = vst [vmem:[%s3304_s18 + $0x368] sm:$0xff] %v1799_v30  ;;  %2125 = vst [vmem:[%s3304_s18 + $0x378] sm:$0xff] %v1992_v1  ;;  %v1803_v17 = vadd.f32 %v1802_v8, %v3291_v5  ;;  %v1996_v44 = vadd.f32 %v1995_v0, %v3293_v25 }
 0x30a   : > { %v1804_v36 = vpop.f32.mrf.mxu1  ;;  %v1997_v13 = vpop.f32.mrf.mxu0 }
 0x30b   : > { %2126 = vst [vmem:[%s3304_s18 + $0x380] sm:$0xff] %v1803_v17  ;;  %2128 = vst [vmem:[%s3304_s18 + $0x390] sm:$0xff] %v1996_v44  ;;  %v1805_v15 = vadd.f32 %v1804_v36, %v3297_v2  ;;  %v1998_v52 = vadd.f32 %v1997_v13, %v3299_v4 }
 0x30c   : > { %v1806_v26 = vpop.f32.mrf.mxu1  ;;  %v1999_v41 = vpop.f32.mrf.mxu0 }
 0x30d   : > { %2127 = vst [vmem:[%s3304_s18 + $0x388] sm:$0xff] %v1805_v15  ;;  %2129 = vst [vmem:[%s3304_s18 + $0x398] sm:$0xff] %v1998_v52  ;;  %v1807_v48 = vadd.f32 %v1806_v26, %v3291_v5  ;;  %v2000_v22 = vadd.f32 %v1999_v41, %v3293_v25 }
 0x30e   : > { %v1808_v19 = vpop.f32.mrf.mxu1  ;;  %v2001_v23 = vpop.f32.mrf.mxu0 }
 0x30f   : > { %2130 = vst [vmem:[%s3304_s18 + $0x3a0] sm:$0xff] %v1807_v48  ;;  %2132 = vst [vmem:[%s3304_s18 + $0x3b0] sm:$0xff] %v2000_v22  ;;  %v1809_v9 = vadd.f32 %v1808_v19, %v3297_v2  ;;  %v2002_v35 = vadd.f32 %v2001_v23, %v3299_v4 }
 0x310   : > { %v1812_v51 = vpop.f32.mrf.mxu1  ;;  %v2005_v50 = vpop.f32.mrf.mxu0 }
 0x311   : > { %2131 = vst [vmem:[%s3304_s18 + $0x3a8] sm:$0xff] %v1809_v9  ;;  %2133 = vst [vmem:[%s3304_s18 + $0x3b8] sm:$0xff] %v2002_v35  ;;  %v1813_v6 = vadd.f32 %v1812_v51, %v3291_v5  ;;  %v2006_v47 = vadd.f32 %v2005_v50, %v3293_v25 }
 0x312   : > { %v1814_v40 = vpop.f32.mrf.mxu1  ;;  %v2007_v14 = vpop.f32.mrf.mxu0 }
 0x313   : > { %2134 = vst [vmem:[%s3304_s18 + $0x3c0] sm:$0xff] %v1813_v6  ;;  %2136 = vst [vmem:[%s3304_s18 + $0x3d0] sm:$0xff] %v2006_v47  ;;  %v1815_v11 = vadd.f32 %v1814_v40, %v3297_v2  ;;  %v2008_v18 = vadd.f32 %v2007_v14, %v3299_v4 }
 0x314   : > { %v1816_v12 = vpop.f32.mrf.mxu1  ;;  %v2009_v20 = vpop.f32.mrf.mxu0 }
 0x315   : > { %2135 = vst [vmem:[%s3304_s18 + $0x3c8] sm:$0xff] %v1815_v11  ;;  %2137 = vst [vmem:[%s3304_s18 + $0x3d8] sm:$0xff] %v2008_v18  ;;  %v1817_v21 = vadd.f32 %v1816_v12, %v3291_v5  ;;  %v2010_v24 = vadd.f32 %v2009_v20, %v3293_v25 }
 0x316   : > { %v1818_v57 = vpop.f32.mrf.mxu1  ;;  %v2011_v27 = vpop.f32.mrf.mxu0 }
 0x317   : > { %2138 = vst [vmem:[%s3304_s18 + $0x3e0] sm:$0xff] %v1817_v21  ;;  %2140 = vst [vmem:[%s3304_s18 + $0x3f0] sm:$0xff] %v2010_v24  ;;  %v1819_v10 = vadd.f32 %v1818_v57, %v3297_v2  ;;  %v2012_v28 = vadd.f32 %v2011_v27, %v3299_v4 }
 0x319   : > { %2139 = vst [vmem:[%s3304_s18 + $0x3e8] sm:$0xff] %v1819_v10  ;;  %2141 = vst [vmem:[%s3304_s18 + $0x3f8] sm:$0xff] %v2012_v28 }
 0x31a PF: > { %s17_s26 = sadd.s32 1, %s2763_s26   ;;  %s3579_s24 = smov %s2759_s25 }
 0x31b   : > { %p14_p5 = scmp.ge.s32.totalorder %s17_s26, 4   ;;  %s3580_s25 = smov %s3582_s27 }
 0x31d   :  { %16 = sbr.rel (!%p14_p5) target bundleno = 2 (0x2), region = 88 }

</bundles_post_ra>
